<compile_context>
chip_gen: v7x
topology: tpu7x:2x2x1
jax: 0.10.0
libtpu: 0.0.40
codegen_flags: <defaults>
</compile_context>

<pallas_src>
import functools

import numpy as np
import jax
import jax.numpy as jnp
from jax.experimental import pallas as pl
from jax.experimental.pallas import tpu as pltpu


def _round_up(x: int, m: int) -> int:
    return (x + m - 1) // m * m


# ---------------------------------------------------------------------------
# Constant-matrix construction (host-side numpy; cached per configuration).
# ---------------------------------------------------------------------------
@functools.lru_cache(maxsize=None)
def _build_constants_np(n_bands: int, block_size: int):
    """Fold irfft/roll/hann/pad/rfft/irfft into three constant tensors.

      W : (2, T,    Kp)  noise @ W[0]/W[1] -> Re/Im of rfft(pad(noise, (0, T)))
      A : (2, Nb_p, Kp)  H     @ A[0]/A[1] -> Re/Im of rfft(pad(impulse, (T, 0)))
      B2: (2, Kp,   Tp)  p_re @ B2[0] + p_im @ B2[1] -> last T samples of irfft

    All padding rows/cols are zero, so padded math equals the unpadded math.
    """
    Nb, T = n_bands, block_size
    N = 2 * (Nb - 1)                  # filter_size produced by torch.fft.irfft
    assert T >= N, "block_size must be >= 2*(n_bands-1)"
    K = T + 1                         # rfft bins of the length-2T sequences
    L = 2 * T
    Kp = _round_up(K, 128)            # lane-padded spectrum width
    Nb_p = _round_up(Nb, 128)         # lane-padded band count (H contraction dim)
    Tp = _round_up(T, 128)            # lane-dense output width

    # --- amp_to_impulse_response folded into M: impulse = H @ M, M: (Nb, T) ---
    k = np.arange(Nb)[:, None]
    n = np.arange(N)[None, :]
    w = np.ones(Nb)
    w[1:Nb - 1] = 2.0
    C = (w[:, None] / N) * np.cos(2.0 * np.pi * k * n / N)       # irfft of real spectrum
    C = np.roll(C, N // 2, axis=-1)                               # torch.roll(+N//2)
    win = 0.5 - 0.5 * np.cos(2.0 * np.pi * np.arange(N) / N)      # periodic hann
    C = C * win[None, :]
    C = np.pad(C, ((0, 0), (0, T - N)))                           # pad to block_size
    M = np.roll(C, -(N // 2), axis=-1)                            # torch.roll(-N//2)

    # --- fft_convolve folded into real-DFT matrices (circular conv, length 2T) ---
    t = np.arange(T)
    kk = np.arange(K)
    theta = 2.0 * np.pi * np.outer(t, kk) / L                     # (T, K)
    Wc, Ws = np.cos(theta), np.sin(theta)                         # rfft(noise_pad)
    sign = (-1.0) ** kk                                           # kernel right-aligned
    A_re = (M @ Wc) * sign[None, :]                               # H -> Re(rfft(kernel))
    A_im = (M @ (-Ws)) * sign[None, :]                            # H -> Im(rfft(kernel))

    w2 = np.ones(K)
    w2[1:K - 1] = 2.0
    phi = 2.0 * np.pi * np.outer(kk, T + t) / L                   # last T output samples
    IR_re = (w2[:, None] / L) * np.cos(phi)                       # (K, T)
    IR_im = -(w2[:, None] / L) * np.sin(phi)                      # (K, T)

    W = np.zeros((2, T, Kp), np.float32)
    W[0, :, :K] = Wc
    W[1, :, :K] = -Ws
    A = np.zeros((2, Nb_p, Kp), np.float32)
    A[0, :Nb, :K] = A_re
    A[1, :Nb, :K] = A_im
    B2 = np.zeros((2, Kp, Tp), np.float32)
    B2[0, :K, :T] = IR_re
    B2[1, :K, :T] = IR_im
    return W, A, B2, Kp, Nb_p, Tp


def _pick_k_chunk(Kp, T, Nb_p, Tp, budget_bytes=8 * 2**20):
    """Largest K-chunk (multiple of 128 dividing Kp) whose bf16 constants fit."""
    candidates = [Kp] + [c for c in (4096, 2048, 1024, 512, 256, 128)
                         if c < Kp and Kp % c == 0]
    for kc in candidates:
        bufs = 1 if kc == Kp else 2            # grid-invariant -> single-buffered
        if 4 * kc * (T + Nb_p + Tp) * bufs <= budget_bytes:
            return kc
    return 128


# ---------------------------------------------------------------------------
# Pallas kernel: per (row tile, K chunk) step -> 4 bf16 MXU dots, complex bin
# product on the VPU, 2 accumulating dots into the lane-dense f32 output block.
# ---------------------------------------------------------------------------
def _filtered_noise_kernel(noise_ref, h_ref, w_ref, a_ref, b2_ref, out_ref):
    nb = noise_ref[...].astype(jnp.bfloat16)          # (rt, T)
    hb = h_ref[...].astype(jnp.bfloat16)              # (rt, Nb_p)

    # Spectra of the zero-padded noise and of the impulse response (this chunk).
    ns_re = jnp.dot(nb, w_ref[0], preferred_element_type=jnp.float32)
    ns_im = jnp.dot(nb, w_ref[1], preferred_element_type=jnp.float32)
    is_re = jnp.dot(hb, a_ref[0], preferred_element_type=jnp.float32)
    is_im = jnp.dot(hb, a_ref[1], preferred_element_type=jnp.float32)

    # Complex spectrum product (elementwise per bin -> chunking over K is exact).
    p_re = (ns_re * is_re - ns_im * is_im).astype(jnp.bfloat16)
    p_im = (ns_re * is_im + ns_im * is_re).astype(jnp.bfloat16)

    # Partial irfft contribution of this K chunk (last block_size samples).
    partial = jnp.dot(p_re, b2_ref[0], preferred_element_type=jnp.float32)
    partial = partial + jnp.dot(p_im, b2_ref[1], preferred_element_type=jnp.float32)

    @pl.when(pl.program_id(1) == 0)
    def _():
        out_ref[...] = jnp.zeros_like(out_ref)
    out_ref[...] += partial


def filtered_noise_forward(H, noise, block_size, row_tile=None):
    """H: (B, F, n_bands) filter magnitudes, noise: (B, F, block_size) in [-1, 1).

    Returns (B, F * block_size) filtered noise, matching FilteredNoise.forward.
    """
    B, F, Nb = H.shape
    T = block_size
    assert noise.shape == (B, F, T)
    rows = B * F

    W_np, A_np, B2_np, Kp, Nb_p, Tp = _build_constants_np(Nb, T)

    # Row tile: big tiles amortize ~0.35us/step, but keep >=2 "parallel" steps so
    # both v7x TensorCores get work (irrelevant on v5e/v6e, 1 TC).
    if row_tile is None:
        row_tile = max(8, min(512, _round_up(max(rows // 2, 1), 8)))
    else:
        row_tile = max(8, _round_up(row_tile, 8))
    rows_p = _round_up(rows, row_tile)

    kc = _pick_k_chunk(Kp, T, Nb_p, Tp)
    k_steps = Kp // kc

    # Inputs stay f32 (cast to bf16 in-kernel); only H gets a tiny lane pad.
    noise2 = noise.reshape(rows, T).astype(jnp.float32)
    h2 = H.reshape(rows, Nb).astype(jnp.float32)
    pad_r = rows_p - rows
    h2 = jnp.pad(h2, ((0, pad_r), (0, Nb_p - Nb)))
    if pad_r:
        noise2 = jnp.pad(noise2, ((0, pad_r), (0, 0)))

    # Constants converted per call (lru_cache keeps only numpy; nothing pinned).
    Wc = jnp.asarray(W_np, jnp.bfloat16)
    Ac = jnp.asarray(A_np, jnp.bfloat16)
    B2c = jnp.asarray(B2_np, jnp.bfloat16)

    # VMEM limit derived from the actual footprint (capped well below v7x's 64 MiB).
    const_bufs = 1 if k_steps == 1 else 2
    const_bytes = 4 * kc * (T + Nb_p + Tp) * const_bufs            # bf16 constants
    io_bytes = 2 * 4 * row_tile * (T + Nb_p + Tp)                  # double-buffered f32 tiles
    vmem_limit = int(min(48 * 2**20, max(16 * 2**20, 1.3 * (const_bytes + io_bytes))))

    grid = (rows_p // row_tile, k_steps)

    def _make_call(const_mode):
        def cspec(shape, index_map):
            if const_mode is None:
                return pl.BlockSpec(shape, index_map)
            return pl.BlockSpec(shape, index_map, pipeline_mode=const_mode)

        return pl.pallas_call(
            _filtered_noise_kernel,
            out_shape=jax.ShapeDtypeStruct((rows_p, Tp), jnp.float32),
            grid_spec=pltpu.PrefetchScalarGridSpec(
                num_scalar_prefetch=0,
                grid=grid,
                in_specs=[
                    pl.BlockSpec((row_tile, T), lambda i, k: (i, 0)),       # noise rows
                    pl.BlockSpec((row_tile, Nb_p), lambda i, k: (i, 0)),    # H rows
                    cspec((2, T, kc), lambda i, k: (0, 0, k)),              # W chunk
                    cspec((2, Nb_p, kc), lambda i, k: (0, 0, k)),           # A chunk
                    cspec((2, kc, Tp), lambda i, k: (0, k, 0)),             # B2 chunk
                ],
                out_specs=pl.BlockSpec((row_tile, Tp), lambda i, k: (i, 0)),
            ),
            compiler_params=pltpu.CompilerParams(
                dimension_semantics=("parallel", "arbitrary"),
                vmem_limit_bytes=vmem_limit,
            ),
        )

    # Single-buffer the constants only when they are grid-invariant (k_steps == 1);
    # fall back to default double-buffering if Buffered(1) is not supported.
    const_mode = pl.Buffered(1) if k_steps == 1 else None
    try:
        out = _make_call(const_mode)(noise2, h2, Wc, Ac, B2c)
    except Exception:
        if const_mode is None:
            raise
        out = _make_call(None)(noise2, h2, Wc, Ac, B2c)

    return out[:rows, :T].reshape(B, F * T)


# ---------------------------------------------------------------------------
# Pure-JAX reference (mirrors the PyTorch code with jnp.fft) for verification.
# ---------------------------------------------------------------------------
def _reference(H, noise, block_size):
    amp = H.astype(jnp.complex64)                      # stack([H, 0]) -> complex
    y = jnp.fft.irfft(amp)                             # (..., 2*(Nb-1))
    N = y.shape[-1]
    y = jnp.roll(y, N // 2, axis=-1)
    win = 0.5 - 0.5 * jnp.cos(2.0 * jnp.pi * jnp.arange(N) / N)
    y = y * win
    y = jnp.pad(y, ((0, 0), (0, 0), (0, block_size - N)))
    y = jnp.roll(y, -(N // 2), axis=-1)
    sig = jnp.pad(noise, ((0, 0), (0, 0), (0, block_size)))
    ker = jnp.pad(y, ((0, 0), (0, 0), (block_size, 0)))
    out = jnp.fft.irfft(jnp.fft.rfft(sig) * jnp.fft.rfft(ker))
    out = out[..., out.shape[-1] // 2:]
    return out.reshape(out.shape[0], -1)


if __name__ == "__main__":
    block_size = 64                      # conf.hop_length
    B, F = 2, 8                          # batch, frames
    n_bands = block_size // 2 + 1        # 33 -> filter_size == block_size

    key = jax.random.PRNGKey(0)
    k_h, k_n = jax.random.split(key)
    H = jax.random.uniform(k_h, (B, F, n_bands), dtype=jnp.float32)
    # TODO(synk): torch.rand(...)*2-1 is generated here with jax.random (wrapper) so
    # the FFT reference can verify the filtering; an in-kernel pltpu.prng_* stream
    # would not match any framework RNG and would be unverifiable.
    noise = jax.random.uniform(k_n, (B, F, block_size), dtype=jnp.float32) * 2.0 - 1.0

    out = filtered_noise_forward(H, noise, block_size)
    out = jax.block_until_ready(out)

    ref = _reference(H, noise, block_size)
    # Tolerance accounts for bf16 MXU operand rounding (f32 accumulation) through
    # the cascaded DFT-matrix formulation; outputs are O(0.5).
    np.testing.assert_allclose(np.asarray(out), np.asarray(ref), atol=3e-2, rtol=3e-2)
    assert out.shape == (B, F * block_size)
    print("KERNEL_OK")
</pallas_src>

<mosaic_0001>
module attributes {stable_mosaic.version = 11 : i64} {
  func.func @_filtered_noise_kernel(%arg0: i32, %arg1: i32, %arg2: memref<8x64xf32, #tpu.memory_space<vmem>>, %arg3: memref<8x128xf32, #tpu.memory_space<vmem>>, %arg4: memref<2x64x128xbf16, #tpu.memory_space<vmem>>, %arg5: memref<2x128x128xbf16, #tpu.memory_space<vmem>>, %arg6: memref<2x128x128xbf16, #tpu.memory_space<vmem>>, %arg7: memref<8x128xf32, #tpu.memory_space<vmem>>) attributes {dimension_semantics = [#tpu.dimension_semantics<parallel>, #tpu.dimension_semantics<arbitrary>], iteration_bounds = array<i64: 2, 1>, scalar_prefetch = 0 : i64, scratch_operands = 0 : i64, tpu.core_type = #tpu.core_type<tc>, window_params = [{transform_indices = @transform_0, window_bounds = array<i64: 8, 64>}, {transform_indices = @transform_1, window_bounds = array<i64: 8, 128>}, {pipeline_mode = #tpu.pipeline_mode<synchronous>, transform_indices = @transform_2, window_bounds = array<i64: 2, 64, 128>}, {pipeline_mode = #tpu.pipeline_mode<synchronous>, transform_indices = @transform_3, window_bounds = array<i64: 2, 128, 128>}, {pipeline_mode = #tpu.pipeline_mode<synchronous>, transform_indices = @transform_4, window_bounds = array<i64: 2, 128, 128>}, {transform_indices = @transform_5, window_bounds = array<i64: 8, 128>}]} {
    %c0 = arith.constant 0 : index
    %c0_0 = arith.constant 0 : index
    %0 = vector.load %arg2[%c0, %c0_0] : memref<8x64xf32, #tpu.memory_space<vmem>>, vector<8x64xf32>
    %1 = arith.truncf %0 : vector<8x64xf32> to vector<8x64xbf16>
    %c0_1 = arith.constant 0 : index
    %c0_2 = arith.constant 0 : index
    %2 = vector.load %arg3[%c0_1, %c0_2] : memref<8x128xf32, #tpu.memory_space<vmem>>, vector<8x128xf32>
    %3 = arith.truncf %2 : vector<8x128xf32> to vector<8x128xbf16>
    %c0_3 = arith.constant 0 : index
    %c0_4 = arith.constant 0 : index
    %c0_5 = arith.constant 0 : index
    %4 = vector.load %arg4[%c0_3, %c0_4, %c0_5] : memref<2x64x128xbf16, #tpu.memory_space<vmem>>, vector<1x64x128xbf16>
    %5 = vector.shape_cast %4 : vector<1x64x128xbf16> to vector<64x128xbf16>
    %cst = arith.constant dense<0.000000e+00> : vector<8x128xf32>
    %6 = tpu.matmul %1, %5, %cst {dimension_numbers = #tpu.dot_dimension_numbers<[1], [0], [0], [1], [0, 0, 1, 1], [], []>} : vector<8x64xbf16>, vector<64x128xbf16>, vector<8x128xf32> -> vector<8x128xf32>
    %c1 = arith.constant 1 : index
    %c0_6 = arith.constant 0 : index
    %c0_7 = arith.constant 0 : index
    %7 = vector.load %arg4[%c1, %c0_6, %c0_7] : memref<2x64x128xbf16, #tpu.memory_space<vmem>>, vector<1x64x128xbf16>
    %8 = vector.shape_cast %7 : vector<1x64x128xbf16> to vector<64x128xbf16>
    %cst_8 = arith.constant dense<0.000000e+00> : vector<8x128xf32>
    %9 = tpu.matmul %1, %8, %cst_8 {dimension_numbers = #tpu.dot_dimension_numbers<[1], [0], [0], [1], [0, 0, 1, 1], [], []>} : vector<8x64xbf16>, vector<64x128xbf16>, vector<8x128xf32> -> vector<8x128xf32>
    %c0_9 = arith.constant 0 : index
    %c0_10 = arith.constant 0 : index
    %c0_11 = arith.constant 0 : index
    %10 = vector.load %arg5[%c0_9, %c0_10, %c0_11] : memref<2x128x128xbf16, #tpu.memory_space<vmem>>, vector<1x128x128xbf16>
    %11 = vector.shape_cast %10 : vector<1x128x128xbf16> to vector<128x128xbf16>
    %cst_12 = arith.constant dense<0.000000e+00> : vector<8x128xf32>
    %12 = tpu.matmul %3, %11, %cst_12 {dimension_numbers = #tpu.dot_dimension_numbers<[1], [0], [0], [1], [0, 0, 1, 1], [], []>} : vector<8x128xbf16>, vector<128x128xbf16>, vector<8x128xf32> -> vector<8x128xf32>
    %c1_13 = arith.constant 1 : index
    %c0_14 = arith.constant 0 : index
    %c0_15 = arith.constant 0 : index
    %13 = vector.load %arg5[%c1_13, %c0_14, %c0_15] : memref<2x128x128xbf16, #tpu.memory_space<vmem>>, vector<1x128x128xbf16>
    %14 = vector.shape_cast %13 : vector<1x128x128xbf16> to vector<128x128xbf16>
    %cst_16 = arith.constant dense<0.000000e+00> : vector<8x128xf32>
    %15 = tpu.matmul %3, %14, %cst_16 {dimension_numbers = #tpu.dot_dimension_numbers<[1], [0], [0], [1], [0, 0, 1, 1], [], []>} : vector<8x128xbf16>, vector<128x128xbf16>, vector<8x128xf32> -> vector<8x128xf32>
    %16 = arith.mulf %6, %12 : vector<8x128xf32>
    %17 = arith.mulf %9, %15 : vector<8x128xf32>
    %18 = arith.subf %16, %17 : vector<8x128xf32>
    %19 = arith.truncf %18 : vector<8x128xf32> to vector<8x128xbf16>
    %20 = arith.mulf %6, %15 : vector<8x128xf32>
    %21 = arith.mulf %9, %12 : vector<8x128xf32>
    %22 = arith.addf %20, %21 : vector<8x128xf32>
    %23 = arith.truncf %22 : vector<8x128xf32> to vector<8x128xbf16>
    %c0_17 = arith.constant 0 : index
    %c0_18 = arith.constant 0 : index
    %c0_19 = arith.constant 0 : index
    %24 = vector.load %arg6[%c0_17, %c0_18, %c0_19] : memref<2x128x128xbf16, #tpu.memory_space<vmem>>, vector<1x128x128xbf16>
    %25 = vector.shape_cast %24 : vector<1x128x128xbf16> to vector<128x128xbf16>
    %cst_20 = arith.constant dense<0.000000e+00> : vector<8x128xf32>
    %26 = tpu.matmul %19, %25, %cst_20 {dimension_numbers = #tpu.dot_dimension_numbers<[1], [0], [0], [1], [0, 0, 1, 1], [], []>} : vector<8x128xbf16>, vector<128x128xbf16>, vector<8x128xf32> -> vector<8x128xf32>
    %c1_21 = arith.constant 1 : index
    %c0_22 = arith.constant 0 : index
    %c0_23 = arith.constant 0 : index
    %27 = vector.load %arg6[%c1_21, %c0_22, %c0_23] : memref<2x128x128xbf16, #tpu.memory_space<vmem>>, vector<1x128x128xbf16>
    %28 = vector.shape_cast %27 : vector<1x128x128xbf16> to vector<128x128xbf16>
    %cst_24 = arith.constant dense<0.000000e+00> : vector<8x128xf32>
    %29 = tpu.matmul %23, %28, %cst_24 {dimension_numbers = #tpu.dot_dimension_numbers<[1], [0], [0], [1], [0, 0, 1, 1], [], []>} : vector<8x128xbf16>, vector<128x128xbf16>, vector<8x128xf32> -> vector<8x128xf32>
    %30 = arith.addf %26, %29 : vector<8x128xf32>
    %c0_i32 = arith.constant 0 : i32
    %31 = arith.cmpi eq, %arg1, %c0_i32 : i32
    %32 = arith.extui %31 : i1 to i32
    %c0_i32_25 = arith.constant 0 : i32
    %33 = arith.cmpi ne, %32, %c0_i32_25 : i32
    scf.if %33 {
      %cst_30 = arith.constant 0.000000e+00 : f32
      %37 = vector.broadcast %cst_30 : f32 to vector<8x128xf32>
      %c0_31 = arith.constant 0 : index
      %c0_32 = arith.constant 0 : index
      %38 = vector.load %arg7[%c0_31, %c0_32] : memref<8x128xf32, #tpu.memory_space<vmem>>, vector<8x128xf32>
      tpu.vector_store %arg7[%c0_31, %c0_32], %37 {strides = array<i32>} : memref<8x128xf32, #tpu.memory_space<vmem>>, vector<8x128xf32>,
    } else {
    }
    %c0_26 = arith.constant 0 : index
    %c0_27 = arith.constant 0 : index
    %34 = vector.load %arg7[%c0_26, %c0_27] : memref<8x128xf32, #tpu.memory_space<vmem>>, vector<8x128xf32>
    %35 = arith.addf %34, %30 : vector<8x128xf32>
    %c0_28 = arith.constant 0 : index
    %c0_29 = arith.constant 0 : index
    %36 = vector.load %arg7[%c0_28, %c0_29] : memref<8x128xf32, #tpu.memory_space<vmem>>, vector<8x128xf32>
    tpu.vector_store %arg7[%c0_28, %c0_29], %35 {strides = array<i32>} : memref<8x128xf32, #tpu.memory_space<vmem>>, vector<8x128xf32>,
    return
  }
  func.func @transform_0(%arg0: i32, %arg1: i32) -> (i32, i32) {
    %c0_i32 = arith.constant 0 : i32
    %c0_i32_0 = arith.constant 0 : i32
    return %arg0, %c0_i32 : i32, i32
  }
  func.func @transform_1(%arg0: i32, %arg1: i32) -> (i32, i32) {
    %c0_i32 = arith.constant 0 : i32
    %c0_i32_0 = arith.constant 0 : i32
    return %arg0, %c0_i32 : i32, i32
  }
  func.func @transform_2(%arg0: i32, %arg1: i32) -> (i32, i32, i32) {
    %c0_i32 = arith.constant 0 : i32
    %c0_i32_0 = arith.constant 0 : i32
    %c0_i32_1 = arith.constant 0 : i32
    return %c0_i32, %c0_i32_0, %arg1 : i32, i32, i32
  }
  func.func @transform_3(%arg0: i32, %arg1: i32) -> (i32, i32, i32) {
    %c0_i32 = arith.constant 0 : i32
    %c0_i32_0 = arith.constant 0 : i32
    %c0_i32_1 = arith.constant 0 : i32
    return %c0_i32, %c0_i32_0, %arg1 : i32, i32, i32
  }
  func.func @transform_4(%arg0: i32, %arg1: i32) -> (i32, i32, i32) {
    %c0_i32 = arith.constant 0 : i32
    %c0_i32_0 = arith.constant 0 : i32
    %c0_i32_1 = arith.constant 0 : i32
    return %c0_i32, %arg1, %c0_i32_0 : i32, i32, i32
  }
  func.func @transform_5(%arg0: i32, %arg1: i32) -> (i32, i32) {
    %c0_i32 = arith.constant 0 : i32
    %c0_i32_0 = arith.constant 0 : i32
    return %arg0, %c0_i32 : i32, i32
  }
}

module attributes {stable_mosaic.version = 11 : i64} {
  func.func @_filtered_noise_kernel(%arg0: i32, %arg1: i32, %arg2: memref<8x64xf32, #tpu.memory_space<vmem>>, %arg3: memref<8x128xf32, #tpu.memory_space<vmem>>, %arg4: memref<2x64x128xbf16, #tpu.memory_space<vmem>>, %arg5: memref<2x128x128xbf16, #tpu.memory_space<vmem>>, %arg6: memref<2x128x128xbf16, #tpu.memory_space<vmem>>, %arg7: memref<8x128xf32, #tpu.memory_space<vmem>>) attributes {dimension_semantics = [#tpu.dimension_semantics<parallel>, #tpu.dimension_semantics<arbitrary>], iteration_bounds = array<i64: 2, 1>, scalar_prefetch = 0 : i64, scratch_operands = 0 : i64, tpu.core_type = #tpu.core_type<tc>, window_params = [{transform_indices = @transform_0, window_bounds = array<i64: 8, 64>}, {transform_indices = @transform_1, window_bounds = array<i64: 8, 128>}, {transform_indices = @transform_2, window_bounds = array<i64: 2, 64, 128>}, {transform_indices = @transform_3, window_bounds = array<i64: 2, 128, 128>}, {transform_indices = @transform_4, window_bounds = array<i64: 2, 128, 128>}, {transform_indices = @transform_5, window_bounds = array<i64: 8, 128>}]} {
    %c0 = arith.constant 0 : index
    %c0_0 = arith.constant 0 : index
    %0 = vector.load %arg2[%c0, %c0_0] : memref<8x64xf32, #tpu.memory_space<vmem>>, vector<8x64xf32>
    %1 = arith.truncf %0 : vector<8x64xf32> to vector<8x64xbf16>
    %c0_1 = arith.constant 0 : index
    %c0_2 = arith.constant 0 : index
    %2 = vector.load %arg3[%c0_1, %c0_2] : memref<8x128xf32, #tpu.memory_space<vmem>>, vector<8x128xf32>
    %3 = arith.truncf %2 : vector<8x128xf32> to vector<8x128xbf16>
    %c0_3 = arith.constant 0 : index
    %c0_4 = arith.constant 0 : index
    %c0_5 = arith.constant 0 : index
    %4 = vector.load %arg4[%c0_3, %c0_4, %c0_5] : memref<2x64x128xbf16, #tpu.memory_space<vmem>>, vector<1x64x128xbf16>
    %5 = vector.shape_cast %4 : vector<1x64x128xbf16> to vector<64x128xbf16>
    %cst = arith.constant dense<0.000000e+00> : vector<8x128xf32>
    %6 = tpu.matmul %1, %5, %cst {dimension_numbers = #tpu.dot_dimension_numbers<[1], [0], [0], [1], [0, 0, 1, 1], [], []>} : vector<8x64xbf16>, vector<64x128xbf16>, vector<8x128xf32> -> vector<8x128xf32>
    %c1 = arith.constant 1 : index
    %c0_6 = arith.constant 0 : index
    %c0_7 = arith.constant 0 : index
    %7 = vector.load %arg4[%c1, %c0_6, %c0_7] : memref<2x64x128xbf16, #tpu.memory_space<vmem>>, vector<1x64x128xbf16>
    %8 = vector.shape_cast %7 : vector<1x64x128xbf16> to vector<64x128xbf16>
    %cst_8 = arith.constant dense<0.000000e+00> : vector<8x128xf32>
    %9 = tpu.matmul %1, %8, %cst_8 {dimension_numbers = #tpu.dot_dimension_numbers<[1], [0], [0], [1], [0, 0, 1, 1], [], []>} : vector<8x64xbf16>, vector<64x128xbf16>, vector<8x128xf32> -> vector<8x128xf32>
    %c0_9 = arith.constant 0 : index
    %c0_10 = arith.constant 0 : index
    %c0_11 = arith.constant 0 : index
    %10 = vector.load %arg5[%c0_9, %c0_10, %c0_11] : memref<2x128x128xbf16, #tpu.memory_space<vmem>>, vector<1x128x128xbf16>
    %11 = vector.shape_cast %10 : vector<1x128x128xbf16> to vector<128x128xbf16>
    %cst_12 = arith.constant dense<0.000000e+00> : vector<8x128xf32>
    %12 = tpu.matmul %3, %11, %cst_12 {dimension_numbers = #tpu.dot_dimension_numbers<[1], [0], [0], [1], [0, 0, 1, 1], [], []>} : vector<8x128xbf16>, vector<128x128xbf16>, vector<8x128xf32> -> vector<8x128xf32>
    %c1_13 = arith.constant 1 : index
    %c0_14 = arith.constant 0 : index
    %c0_15 = arith.constant 0 : index
    %13 = vector.load %arg5[%c1_13, %c0_14, %c0_15] : memref<2x128x128xbf16, #tpu.memory_space<vmem>>, vector<1x128x128xbf16>
    %14 = vector.shape_cast %13 : vector<1x128x128xbf16> to vector<128x128xbf16>
    %cst_16 = arith.constant dense<0.000000e+00> : vector<8x128xf32>
    %15 = tpu.matmul %3, %14, %cst_16 {dimension_numbers = #tpu.dot_dimension_numbers<[1], [0], [0], [1], [0, 0, 1, 1], [], []>} : vector<8x128xbf16>, vector<128x128xbf16>, vector<8x128xf32> -> vector<8x128xf32>
    %16 = arith.mulf %6, %12 : vector<8x128xf32>
    %17 = arith.mulf %9, %15 : vector<8x128xf32>
    %18 = arith.subf %16, %17 : vector<8x128xf32>
    %19 = arith.truncf %18 : vector<8x128xf32> to vector<8x128xbf16>
    %20 = arith.mulf %6, %15 : vector<8x128xf32>
    %21 = arith.mulf %9, %12 : vector<8x128xf32>
    %22 = arith.addf %20, %21 : vector<8x128xf32>
    %23 = arith.truncf %22 : vector<8x128xf32> to vector<8x128xbf16>
    %c0_17 = arith.constant 0 : index
    %c0_18 = arith.constant 0 : index
    %c0_19 = arith.constant 0 : index
    %24 = vector.load %arg6[%c0_17, %c0_18, %c0_19] : memref<2x128x128xbf16, #tpu.memory_space<vmem>>, vector<1x128x128xbf16>
    %25 = vector.shape_cast %24 : vector<1x128x128xbf16> to vector<128x128xbf16>
    %cst_20 = arith.constant dense<0.000000e+00> : vector<8x128xf32>
    %26 = tpu.matmul %19, %25, %cst_20 {dimension_numbers = #tpu.dot_dimension_numbers<[1], [0], [0], [1], [0, 0, 1, 1], [], []>} : vector<8x128xbf16>, vector<128x128xbf16>, vector<8x128xf32> -> vector<8x128xf32>
    %c1_21 = arith.constant 1 : index
    %c0_22 = arith.constant 0 : index
    %c0_23 = arith.constant 0 : index
    %27 = vector.load %arg6[%c1_21, %c0_22, %c0_23] : memref<2x128x128xbf16, #tpu.memory_space<vmem>>, vector<1x128x128xbf16>
    %28 = vector.shape_cast %27 : vector<1x128x128xbf16> to vector<128x128xbf16>
    %cst_24 = arith.constant dense<0.000000e+00> : vector<8x128xf32>
    %29 = tpu.matmul %23, %28, %cst_24 {dimension_numbers = #tpu.dot_dimension_numbers<[1], [0], [0], [1], [0, 0, 1, 1], [], []>} : vector<8x128xbf16>, vector<128x128xbf16>, vector<8x128xf32> -> vector<8x128xf32>
    %30 = arith.addf %26, %29 : vector<8x128xf32>
    %c0_i32 = arith.constant 0 : i32
    %31 = arith.cmpi eq, %arg1, %c0_i32 : i32
    %32 = arith.extui %31 : i1 to i32
    %c0_i32_25 = arith.constant 0 : i32
    %33 = arith.cmpi ne, %32, %c0_i32_25 : i32
    scf.if %33 {
      %cst_30 = arith.constant 0.000000e+00 : f32
      %37 = vector.broadcast %cst_30 : f32 to vector<8x128xf32>
      %c0_31 = arith.constant 0 : index
      %c0_32 = arith.constant 0 : index
      %38 = vector.load %arg7[%c0_31, %c0_32] : memref<8x128xf32, #tpu.memory_space<vmem>>, vector<8x128xf32>
      tpu.vector_store %arg7[%c0_31, %c0_32], %37 {strides = array<i32>} : memref<8x128xf32, #tpu.memory_space<vmem>>, vector<8x128xf32>,
    } else {
    }
    %c0_26 = arith.constant 0 : index
    %c0_27 = arith.constant 0 : index
    %34 = vector.load %arg7[%c0_26, %c0_27] : memref<8x128xf32, #tpu.memory_space<vmem>>, vector<8x128xf32>
    %35 = arith.addf %34, %30 : vector<8x128xf32>
    %c0_28 = arith.constant 0 : index
    %c0_29 = arith.constant 0 : index
    %36 = vector.load %arg7[%c0_28, %c0_29] : memref<8x128xf32, #tpu.memory_space<vmem>>, vector<8x128xf32>
    tpu.vector_store %arg7[%c0_28, %c0_29], %35 {strides = array<i32>} : memref<8x128xf32, #tpu.memory_space<vmem>>, vector<8x128xf32>,
    return
  }
  func.func @transform_0(%arg0: i32, %arg1: i32) -> (i32, i32) {
    %c0_i32 = arith.constant 0 : i32
    %c0_i32_0 = arith.constant 0 : i32
    return %arg0, %c0_i32 : i32, i32
  }
  func.func @transform_1(%arg0: i32, %arg1: i32) -> (i32, i32) {
    %c0_i32 = arith.constant 0 : i32
    %c0_i32_0 = arith.constant 0 : i32
    return %arg0, %c0_i32 : i32, i32
  }
  func.func @transform_2(%arg0: i32, %arg1: i32) -> (i32, i32, i32) {
    %c0_i32 = arith.constant 0 : i32
    %c0_i32_0 = arith.constant 0 : i32
    %c0_i32_1 = arith.constant 0 : i32
    return %c0_i32, %c0_i32_0, %arg1 : i32, i32, i32
  }
  func.func @transform_3(%arg0: i32, %arg1: i32) -> (i32, i32, i32) {
    %c0_i32 = arith.constant 0 : i32
    %c0_i32_0 = arith.constant 0 : i32
    %c0_i32_1 = arith.constant 0 : i32
    return %c0_i32, %c0_i32_0, %arg1 : i32, i32, i32
  }
  func.func @transform_4(%arg0: i32, %arg1: i32) -> (i32, i32, i32) {
    %c0_i32 = arith.constant 0 : i32
    %c0_i32_0 = arith.constant 0 : i32
    %c0_i32_1 = arith.constant 0 : i32
    return %c0_i32, %arg1, %c0_i32_0 : i32, i32, i32
  }
  func.func @transform_5(%arg0: i32, %arg1: i32) -> (i32, i32) {
    %c0_i32 = arith.constant 0 : i32
    %c0_i32_0 = arith.constant 0 : i32
    return %arg0, %c0_i32 : i32, i32
  }
}

</mosaic_0001>

<bundles_post_ra>
// kernel: tpu_custom_call.1
= control target key start
LH: loop header
LB: loop body
LE: loop exit
PB: predicated region body
PF: predicated region fallthrough
CT: control target
= control target key end

     0   :  { %s2105_s0 = inlined_call_operand.hbm [shape: f32[16,64], index: 0, kind: input, shape index: {}]   ;;  %s2106_s1 = inlined_call_operand.hbm [shape: f32[16,128], index: 1, kind: input, shape index: {}]   ;;  %s2107_s2 = inlined_call_operand.hbm [shape: bf16[2,64,128], index: 2, kind: input, shape index: {}]   ;;  %s2108_s3 = inlined_call_operand.hbm [shape: bf16[2,128,128], index: 3, kind: input, shape index: {}]   ;;  %s2109_s4 = inlined_call_operand.hbm [shape: bf16[2,128,128], index: 4, kind: input, shape index: {}]   ;;  %s2110_s5 = inlined_call_operand.hbm [shape: f32[16,128], index: 5, kind: output, shape index: {}]  }
   0x1   :  { %2116 = sst [smem:[#allocation18_spill]] %s2107_s2 }
   0x2   :  { %2117 = sst [smem:[#allocation19_spill]] %s2108_s3 }
   0x3   :  { %2118 = sst [smem:[#allocation20_spill]] %s2109_s4 }
   0x4   :  { %10 = vsyncpa [#allocation3], 0 }
   0x5   :  { %12 = vsyncpa [#allocation3 + $0x1], 0 }
   0x6   :  { %13 = vsyncpa [#allocation6], 0 }
   0x7   :  { %15 = vsyncpa [#allocation6 + $0x1], 0 }
   0x8   :  { %16 = vsyncpa [#allocation9], 0 }
   0x9   :  { %17 = vsyncpa [#allocation4], 0 }
   0xa   :  { %19 = vsyncpa [#allocation4 + $0x1], 0  ;;  %s1728_s18 = smov 0   ;;  %s1730_s19 = smov 0  }
   0xb   :  { %s1732_s20 = smov 0   ;;  %s1734_s21 = smov 0  }
   0xc   :  { %s1736_s22 = smov 0   ;;  %s1738_s23 = smov 0  }
   0xd LB: > { %s1759_s24 = sadd.s32 4294967295, %s1686_s23   ;;  %s1093_s25 = sadd.s32 4294967294, %s1686_s23   ;;  %s1686_s23 = sphi %s1738_s23, %s25_s23   ;;  %s1682_s22 = sphi %s1736_s22, %s2145_s22   ;;  %s1678_s21 = sphi %s1734_s21, %s2144_s21   ;;  %s1674_s20 = sphi %s1732_s20, %s2143_s20   ;;  %s1670_s19 = sphi %s1730_s19, %s2142_s19   ;;  %s1666_s18 = sphi %s1728_s18, %s2141_s18  }
   0xe   : > { %p57_p0 = scmp.ne.s32.totalorder %s1670_s19, %s1666_s18  ;;  %p2111_p1 = scmp.eq.s32.totalorder %s1759_s24, 0 }
   0xf   : > { %p191_p3 = scmp.eq.s32.totalorder %s1093_s25, 1  ;;  %p1094_p5 = scmp.ge.s32.totalorder %s1686_s23, 1 }
  0x10   : > { %p1768_p4 = por %p2111_p1, %p57_p0  ;;  %p198_p7 = scmp.lt.s32.totalorder %s1686_s23, 3 }
  0x11   : > { %p1773_p6 = por %p191_p3, %p57_p0  ;;  %s1688_s29 = smov [#allocation7]  }
  0x12   : > { %s2119_s26 = scalar_select %p1768_p4, 1, 0 }
  0x13   : > { %s2120_s27 = scalar_select %p1773_p6, 1, 0 }
  0x14   : > { %p1778_p8 = pnand %p1094_p5, %p198_p7  ;;  %s212_s30 = sshll.u32 %s1688_s29, 4  ;;  %s1782_s30 = int_to_ptr.vmem [resolvable:$true] %s212_s30 }
  0x15   : > { %2121 = sst [smem:[#allocation17_spill]] %s2120_s27  ;;  %s1689_s7 = smov [#allocation8]  }
  0x16   : > { %s2122_s28 = scalar_select %p1778_p8, 1, 0 }
  0x17   : > { %p1324_p9 = pneg %p1778_p8  ;;  %s227_s8 = sshll.u32 %s1689_s7, 4  ;;  %s1793_s8 = int_to_ptr.vmem [resolvable:$true] %s227_s8 }
  0x18   : > { %s1690_s9 = smov [#allocation10]   ;;  %s2124_s2 = sld [smem:[#allocation18_spill]] }
  0x19   : > { %p1789_p11 = pnand %p1324_p9, %p2111_p1  ;;  %s1795_s10 = sshll.u32 %s1690_s9, 4  ;;  %s244_s10 = int_to_ptr.vmem [resolvable:$true] %s1795_s10 }
  0x1b   : > { %p1805_p13 = pneg %p1789_p11 }
  0x1e   : > { %s1448_s13 = scalar_lea.hbm %s2124_s2, 1024 }
  0x1f   : > { %p1449_p12 = scmp.ne.s32.totalorder %s2124_s2, %s1448_s13  ;;  %p1455_p5 = scmp.lt.u32.totalorder %s1448_s13, %s2124_s2 }
  0x21   : > { %p1451_p0 = pnand %p1805_p13, %p1449_p12 }
  0x23   : > { %p1452_p3 = pneg %p1451_p0 }
  0x25   : > { %p1457_p7 = pnand %p1455_p5, %p1452_p3 }
  0x27   : > { %1460 = shalt.err (!%p1457_p7)
}
  0x28   : > { %s1461_s29 = scalar_lea.vmem %s1782_s30, 1024  ;;  %p1469_p2 = scmp.lt.s32.totalorder %s1782_s30, %s1782_s30 }
  0x29   : > { %p1462_p9 = scmp.ne.s32.totalorder %s1782_s30, %s1461_s29  ;;  %p1470_p6 = scmp.lt.s32.totalorder %s1461_s29, %s1461_s29 }
  0x2b   : > { %p1464_p10 = pnand %p1462_p9, %p1805_p13  ;;  %p1471_p12 = por %p1470_p6, %p1469_p2 }
  0x2d   : > { %p1465_p1 = pneg %p1464_p10 }
  0x2f   : > { %p1472_p0 = pnand %p1471_p12, %p1465_p1 }
  0x31   : > { %1475 = shalt.err (!%p1472_p0)
}
  0x32   : > { %s1691_s7 = smov 64   ;;  %s1692_s9 = smov 4  }
  0x33   : > { %1327 = dma.hbm_to_vmem [thread:$0]  (!%p1789_p11), %s2124_s2, 1024, %s1782_s30, [#allocation6], %s1691_s7, %s1691_s7, %s1692_s9  }
  0x34   : > { %s2126_s3 = sld [smem:[#allocation19_spill]] }
  0x3a   : > { %s1476_s15 = scalar_lea.hbm %s2126_s3, 2048 }
  0x3b   : > { %p1477_p1 = scmp.ne.s32.totalorder %s2126_s3, %s1476_s15  ;;  %p1483_p10 = scmp.lt.u32.totalorder %s1476_s15, %s2126_s3 }
  0x3d   : > { %p1479_p2 = pnand %p1477_p1, %p1805_p13 }
  0x3f   : > { %p1480_p6 = pneg %p1479_p2 }
  0x41   : > { %p1485_p3 = pnand %p1483_p10, %p1480_p6 }
  0x43   : > { %1488 = shalt.err (!%p1485_p3)
}
  0x44   : > { %s1489_s30 = scalar_lea.vmem %s1793_s8, 2048  ;;  %p1497_p12 = scmp.lt.s32.totalorder %s1793_s8, %s1793_s8 }
  0x45   : > { %p1490_p5 = scmp.ne.s32.totalorder %s1793_s8, %s1489_s30  ;;  %p1498_p0 = scmp.lt.s32.totalorder %s1489_s30, %s1489_s30 }
  0x47   : > { %p1492_p7 = pnand %p1490_p5, %p1805_p13  ;;  %p1499_p1 = por %p1498_p0, %p1497_p12 }
  0x49   : > { %p1493_p9 = pneg %p1492_p7 }
  0x4b   : > { %p1500_p2 = pnand %p1499_p1, %p1493_p9 }
  0x4d   : > { %1503 = shalt.err (!%p1500_p2)
}
  0x4e   : > { %1330 = dma.hbm_to_vmem [thread:$0]  (!%p1789_p11), %s2126_s3, 2048, %s1793_s8, [#allocation9], %s1691_s7, %s1691_s7, %s1692_s9  }
  0x4f   : > { %s2127_s4 = sld [smem:[#allocation20_spill]] }
  0x55   : > { %s1504_s14 = scalar_lea.hbm %s2127_s4, 2048 }
  0x56   : > { %p1505_p6 = scmp.ne.s32.totalorder %s2127_s4, %s1504_s14  ;;  %p1511_p5 = scmp.lt.u32.totalorder %s1504_s14, %s2127_s4 }
  0x58   : > { %p1507_p10 = pnand %p1505_p6, %p1805_p13 }
  0x5a   : > { %p1508_p3 = pneg %p1507_p10 }
  0x5c   : > { %p1513_p7 = pnand %p1511_p5, %p1508_p3 }
  0x5e   : > { %1516 = shalt.err (!%p1513_p7)
}
  0x5f   : > { %s1517_s30 = scalar_lea.vmem %s244_s10, 2048  ;;  %p1525_p1 = scmp.lt.s32.totalorder %s244_s10, %s244_s10 }
  0x60   : > { %p1518_p9 = scmp.ne.s32.totalorder %s244_s10, %s1517_s30  ;;  %p1526_p2 = scmp.lt.s32.totalorder %s1517_s30, %s1517_s30 }
  0x62   : > { %p1520_p12 = pnand %p1518_p9, %p1805_p13  ;;  %p1527_p4 = por %p1526_p2, %p1525_p1 }
  0x64   : > { %p1521_p0 = pneg %p1520_p12 }
  0x66   : > { %p1528_p8 = pnand %p1527_p4, %p1521_p0 }
  0x68   : > { %1531 = shalt.err (!%p1528_p8)
}
  0x69   : > { %1333 = dma.hbm_to_vmem [thread:$0]  (!%p1789_p11), %s2127_s4, 2048, %s244_s10, [#allocation9], %s1691_s7, %s1691_s7, %s1692_s9  }
  0x6a   : > { %s44_s16 = sadd.s32 1, %s1674_s20  ;;  %s37_s6 = sadd.s32 1, %s1682_s22 }
  0x6b   : > { %p51_p4 = scmp.ne.s32.totalorder %s1674_s20, %s1670_s19  ;;  %p39_p8 = scmp.ge.s32.totalorder %s37_s6, 2 }
  0x6c   : > { %p52_p13 = scmp.eq.s32.totalorder %s1686_s23, 0  ;;  %p2128_p6 = scmp.eq.s32.totalorder %s1759_s24, 1 }
  0x6d   : > { %p1348_p3 = scmp.lt.s32.totalorder %s1686_s23, 2  ;;  %s2147_s6 = smov (%p39_p8, %s37_s6), 0 }
  0x6e   : > { %p1884_p10 = por %p2128_p6, %p51_p4  ;;  %p53_p5 = por %p52_p13, %p51_p4 }
  0x6f   : > { %s257_s12 = sand.u32 1, %s1674_s20   ;;  %s41_s13 = ssub.s32 %s1682_s22, %s2147_s6 }
  0x70   : > { %s2129_s11 = scalar_select %p1884_p10, 1, 0 }
  0x71   : > { %p42_p11 = scmp.eq.s32.totalorder %s41_s13, 0  ;;  %s1894_s10 = sshll.u32 %s257_s12, 3 }
  0x72   : > { %s1100_s7 = sshll.u32 %s1682_s22, 7  ;;  %s261_s25 = scalar_lea.vmem [#allocation2], %s1894_s10 }
  0x73   : > { %s1898_s9 = scalar_select %p42_p11, %s1674_s20, %s44_s16  }
  0x74   : > { %s1903_s17 = scalar_lea.hbm %s2105_s0, %s1100_s7  ;;  %s268_s29 = sshll.u32 %s261_s25, 4  ;;  %s1906_s29 = int_to_ptr.vmem [resolvable:$true] %s268_s29 }
  0x75   : > { %p1910_p7 = pnand %p1348_p3, %p53_p5  ;;  %s1917_s16 = scalar_lea.hbm %s2106_s1, %s1100_s7 }
  0x76   : > { %s275_s13 = sand.u32 1, %s1686_s23   ;;  %s258_s14 = scalar_lea.sflag [#allocation3], %s257_s12 }
  0x77   : > { %s1532_s15 = scalar_lea.hbm %s1903_s17, 128  ;;  %p1534_p12 = pneg %p1910_p7 }
  0x78   : > { %p1533_p9 = scmp.ne.s32.totalorder %s1903_s17, %s1532_s15  ;;  %s1537_s3 = scalar_lea.hbm %s2105_s0, 256 }
  0x79   : > { %p1538_p2 = scmp.lt.u32.totalorder %s1903_s17, %s2105_s0  ;;  %p1539_p4 = scmp.lt.u32.totalorder %s1537_s3, %s1532_s15 }
  0x7a   : > { %p1535_p0 = pnand %p1534_p12, %p1533_p9  ;;  %p1541_p13 = scmp.lt.u32.totalorder %s1532_s15, %s1903_s17 }
  0x7b   : > { %p1540_p8 = por %p1539_p4, %p1538_p2 }
  0x7c   : > { %p1536_p1 = pneg %p1535_p0 }
  0x7d   : > { %p1542_p6 = por %p1541_p13, %p1540_p8 }
  0x7f   : > { %p1543_p3 = pnand %p1542_p6, %p1536_p1 }
  0x81   : > { %1546 = shalt.err (!%p1543_p3)
}
  0x82   : > { %s1547_s12 = scalar_lea.vmem %s1906_s29, 128  ;;  %s1693_s2 = smov [#allocation2]  }
  0x83   : > { %p1548_p5 = scmp.ne.s32.totalorder %s1906_s29, %s1547_s12  ;;  %s1552_s7 = sshll.u32 %s1693_s2, 4  ;;  %s1553_s7 = int_to_ptr.vmem [resolvable:$false] %s1552_s7 }
  0x84   : > { %s1554_s4 = scalar_lea.vmem %s1553_s7, 256  ;;  %p1555_p0 = scmp.lt.s32.totalorder %s1906_s29, %s1553_s7 }
  0x85   : > { %p1550_p11 = pnand %p1548_p5, %p1534_p12  ;;  %p1556_p2 = scmp.lt.s32.totalorder %s1554_s4, %s1547_s12 }
  0x87   : > { %p1551_p9 = pneg %p1550_p11  ;;  %p1557_p4 = por %p1556_p2, %p1555_p0 }
  0x89   : > { %p1558_p8 = pnand %p1557_p4, %p1551_p9 }
  0x8b   : > { %1561 = shalt.err (!%p1558_p8)
}
  0x8c   : > { %1337 = dma.hbm_to_vmem [thread:$0]  (!%p1910_p7), %s1903_s17, 128, %s1906_s29, %s258_s14  }
  0x8d   : > { %s279_s3 = scalar_lea.vmem [#allocation5], %s1894_s10  ;;  %s276_s15 = scalar_lea.sflag [#allocation6], %s275_s13 }
  0x8e   : > { %s286_s27 = sshll.u32 %s279_s3, 4  ;;  %s1562_s25 = scalar_lea.hbm %s1917_s16, 128  ;;  %s287_s27 = int_to_ptr.vmem [resolvable:$true] %s286_s27 }
  0x8f   : > { %p1563_p1 = scmp.ne.s32.totalorder %s1917_s16, %s1562_s25  ;;  %s1567_s2 = scalar_lea.hbm %s2106_s1, 256 }
  0x90   : > { %p1568_p3 = scmp.lt.u32.totalorder %s1917_s16, %s2106_s1  ;;  %p1569_p5 = scmp.lt.u32.totalorder %s1567_s2, %s1562_s25 }
  0x91   : > { %p1565_p13 = pnand %p1563_p1, %p1534_p12  ;;  %p1571_p9 = scmp.lt.u32.totalorder %s1562_s25, %s1917_s16 }
  0x92   : > { %p1570_p11 = por %p1569_p5, %p1568_p3 }
  0x93   : > { %p1566_p6 = pneg %p1565_p13 }
  0x94   : > { %p1572_p0 = por %p1571_p9, %p1570_p11 }
  0x96   : > { %p1573_p2 = pnand %p1572_p0, %p1566_p6 }
  0x98   : > { %1576 = shalt.err (!%p1573_p2)
}
  0x99   : > { %s1577_s10 = scalar_lea.vmem %s287_s27, 128  ;;  %s1694_s17 = smov [#allocation5]  }
  0x9a   : > { %p1578_p4 = scmp.ne.s32.totalorder %s287_s27, %s1577_s10  ;;  %s1582_s29 = sshll.u32 %s1694_s17, 4  ;;  %s1583_s29 = int_to_ptr.vmem [resolvable:$false] %s1582_s29 }
  0x9b   : > { %s1584_s13 = scalar_lea.vmem %s1583_s29, 256  ;;  %p1585_p13 = scmp.lt.s32.totalorder %s287_s27, %s1583_s29 }
  0x9c   : > { %p1580_p8 = pnand %p1578_p4, %p1534_p12  ;;  %p1586_p10 = scmp.lt.s32.totalorder %s1584_s13, %s1577_s10 }
  0x9e   : > { %p1581_p1 = pneg %p1580_p8  ;;  %p1587_p3 = por %p1586_p10, %p1585_p13 }
  0xa0   : > { %p1588_p5 = pnand %p1587_p3, %p1581_p1 }
  0xa2   : > { %1591 = shalt.err (!%p1588_p5)
}
  0xa3   : > { %1340 = dma.hbm_to_vmem [thread:$0]  (!%p1910_p7), %s1917_s16, 128, %s287_s27, %s276_s15  }
  0xa4   : > { %p2131_p6 = scmp.ne.s32.totalorder %s2122_s28, 0 }
  0xa5   : > { %s1970_s14 = sand.u32 (!%p2131_p6), 1, %s1670_s19   ;;  %p2132_p10 = scmp.ne.s32.totalorder (!%p2131_p6), %s2119_s26, 0 }
  0xa6   : > { %295 = sbr.rel (%p2131_p6) target bundleno = 679 (0x2a7), region = 40  ;;  %s1973_s3 = sshll.u32 (!%p2131_p6), %s1970_s14, 3 }
  0xa7   : > { %s298_s25 = scalar_lea.sflag (!%p2131_p6), [#allocation3], %s1970_s14  ;;  %s301_s8 = scalar_lea.vmem (!%p2131_p6), [#allocation2], %s1973_s3 }
  0xad   : > { %1645 = dma.done.wait (%p2132_p10), %s298_s25, 128  }
  0xae   : > { %1647 = vsyncadd (%p2132_p10), %s298_s25, 4294967168  ;;  %s306_s28 = sand.u32 1, %s1759_s24   ;;  %s310_s16 = scalar_lea.vmem [#allocation5], %s1973_s3 }
  0xaf   : > { %s307_s30 = scalar_lea.sflag [#allocation6], %s306_s28 }
  0xb0   : > { %1649 = dma.done.wait (%p2132_p10), %s307_s30, 128  }
  0xb1   : > { %1651 = vsyncadd (%p2132_p10), %s307_s30, 4294967168  ;;  %p2133_p7 = scmp.eq.s32.totalorder %s1759_s24, 0 }
  0xb3   : > { %1653 = dma.done.wait (%p2133_p7), [#allocation6], 1024   ;;  %p2134_p12 = pmov %p2133_p7 }
  0xb4   : > { %p2135_p11 = pmov %p2133_p7 }
  0xb5   : > { %1655 = vsyncadd (%p2134_p12), [#allocation6], 4294966272 }
  0xb6   : > { %1657 = dma.done.wait (%p2135_p11), [#allocation9], 4096   ;;  %p2136_p9 = pmov %p2133_p7 }
  0xb7   : > { %v1695_v0 = vmov 0.0   ;;  %vm1696_vm0 = vmmov 0   ;;  %v1408_v1 = vld [vmem:[#allocation7] sm:$0xff]   ;;  %v1410_v3 = vld [vmem:[#allocation7 + $0x8] sm:$0xff]   ;;  %v1412_v5 = vld [vmem:[#allocation7 + $0x10] sm:$0xff]   ;;  %vm392_vm1 = vcmask 523264  }
  0xb8   : > { %1659 = vsyncadd (%p2136_p9), [#allocation9], 4294963200  ;;  %1202 = vmatprep.subr.bf16.mxu0 %v1695_v0  ;;  %1214 = vmatprep.subr.bf16.mxu1 %v1695_v0  ;;  %v1409_v2 = vld [vmem:[#allocation7 + $0x20] sm:$0xff]   ;;  %v1411_v4 = vld [vmem:[#allocation7 + $0x28] sm:$0xff]   ;;  %s1153_s24 = sshll.u32 %s1678_s21, 7  ;;  %s353_s26 = scalar_lea.vmem [#allocation11], %s1973_s3 }
  0xb9   : > { %1210 = vmatprep.mubr.msk.bf16.mxu0 %vm1696_vm0, %v1695_v0  ;;  %1222 = vmatprep.mubr.msk.bf16.mxu1 %vm1696_vm0, %v1695_v0  ;;  %v1413_v6 = vld [vmem:[#allocation7 + $0x30] sm:$0xff]   ;;  %v1414_v7 = vld [vmem:[#allocation7 + $0x18] sm:$0xff]   ;;  %v356_v8 = vld [vmem:[%s301_s8] sm:$0xff]  ;;  %s957_s27 = sshll.u32 %s353_s26, 4  ;;  %s2056_s2 = scalar_lea.hbm %s2110_s5, %s1153_s24  ;;  %s2058_s27 = int_to_ptr.vmem [resolvable:$true] %s957_s27 }
  0xba   : > { %1203 = vmatpush3.bf16.msra.mxu0 %v1408_v1  ;;  %1215 = vmatpush3.bf16.msra.mxu1 %v1409_v2  ;;  %v1415_v9 = vld [vmem:[#allocation7 + $0x38] sm:$0xff]   ;;  %v357_v10 = vpack.c.bf16 %v356_v8, %v356_v8  ;;  %v1416_v11 = vld [vmem:[#allocation8] sm:$0xff]   ;;  %v1418_v13 = vld [vmem:[#allocation8 + $0x8] sm:$0xff]   ;;  %s944_s21 = scalar_lea.sflag [#allocation4], %s1970_s14  ;;  %s1592_s7 = scalar_lea.vmem %s2058_s27, 128 }
  0xbb   : > { %1204 = vmatprep.subr.bf16.mxu0 %v1695_v0  ;;  %1216 = vmatprep.subr.bf16.mxu1 %v1695_v0  ;;  %v1417_v12 = vld [vmem:[#allocation8 + $0x40] sm:$0xff]   ;;  %v1419_v14 = vld [vmem:[#allocation8 + $0x48] sm:$0xff]   ;;  %v1420_v15 = vld [vmem:[#allocation8 + $0x10] sm:$0xff]   ;;  %p1593_p0 = scmp.ne.s32.totalorder %s2058_s27, %s1592_s7  ;;  %p2137_p2 = scmp.ne.s32.totalorder %s2129_s11, 0 }
  0xbc   : > { %v1421_v16 = vld [vmem:[#allocation8 + $0x50] sm:$0xff]   ;;  %v1422_v17 = vld [vmem:[#allocation8 + $0x18] sm:$0xff]   ;;  %v1424_v19 = vld [vmem:[#allocation8 + $0x20] sm:$0xff]   ;;  %s1697_s4 = smov [#allocation11]  }
  0xbd   : > { %v1423_v18 = vld [vmem:[#allocation8 + $0x58] sm:$0xff]   ;;  %v1425_v20 = vld [vmem:[#allocation8 + $0x60] sm:$0xff]   ;;  %v1426_v21 = vld [vmem:[#allocation8 + $0x28] sm:$0xff]   ;;  %p1594_p4 = pnand %p1593_p0, %p2137_p2  ;;  %s1596_s10 = sshll.u32 %s1697_s4, 4  ;;  %s1597_s10 = int_to_ptr.vmem [resolvable:$false] %s1596_s10 }
  0xbe   : > { %1205 = vmatpush3.bf16.msra.mxu0 %v1410_v3  ;;  %1217 = vmatpush3.bf16.msra.mxu1 %v1411_v4  ;;  %v1427_v22 = vld [vmem:[#allocation8 + $0x68] sm:$0xff]   ;;  %v1428_v23 = vld [vmem:[#allocation8 + $0x30] sm:$0xff]   ;;  %v1430_v25 = vld [vmem:[#allocation8 + $0x38] sm:$0xff]   ;;  %s1598_s17 = scalar_lea.vmem %s1597_s10, 256  ;;  %p1599_p1 = scmp.lt.s32.totalorder %s2058_s27, %s1597_s10 }
  0xbf   : > { %1206 = vmatprep.subr.bf16.mxu0 %v1695_v0  ;;  %1218 = vmatprep.subr.bf16.mxu1 %v1695_v0  ;;  %v1429_v24 = vld [vmem:[#allocation8 + $0x70] sm:$0xff]   ;;  %v1431_v27 = vld [vmem:[#allocation8 + $0x78] sm:$0xff]   ;;  %v1432_v29 = vld [vmem:[#allocation10 + $0x40] sm:$0xff]   ;;  %p1595_p8 = pneg %p1594_p4  ;;  %p1600_p13 = scmp.lt.s32.totalorder %s1598_s17, %s1592_s7 }
  0xc0   : > { %v358_v26 = vld [vmem:[%s310_s16] sm:$0xff]  ;;  %v1433_v30 = vld [vmem:[#allocation10] sm:$0xff]   ;;  %v1434_v31 = vld [vmem:[#allocation10 + $0x48] sm:$0xff]  }
  0xc1   : > { %v359_v28 = vpack.c.bf16 %v358_v26, %v358_v26  ;;  %v1435_v32 = vld [vmem:[#allocation10 + $0x8] sm:$0xff]   ;;  %v1436_v33 = vld [vmem:[#allocation10 + $0x50] sm:$0xff]   ;;  %v1438_v35 = vld [vmem:[#allocation10 + $0x58] sm:$0xff]   ;;  %p1601_p3 = por %p1600_p13, %p1599_p1 }
  0xc2   : > { %1207 = vmatpush3.bf16.msra.mxu0 %v1412_v5  ;;  %1219 = vmatpush3.bf16.msra.mxu1 %v1413_v6  ;;  %v1437_v34 = vld [vmem:[#allocation10 + $0x10] sm:$0xff]   ;;  %v1439_v36 = vld [vmem:[#allocation10 + $0x18] sm:$0xff]   ;;  %v1440_v37 = vld [vmem:[#allocation10 + $0x60] sm:$0xff]  }
  0xc3   : > { %1208 = vmatprep.subr.bf16.mxu0 %v1695_v0  ;;  %1220 = vmatprep.subr.bf16.mxu1 %v1695_v0  ;;  %v1441_v38 = vld [vmem:[#allocation10 + $0x20] sm:$0xff]   ;;  %v1442_v39 = vld [vmem:[#allocation10 + $0x68] sm:$0xff]   ;;  %v1444_v41 = vld [vmem:[#allocation10 + $0x70] sm:$0xff]   ;;  %p1602_p5 = pnand %p1601_p3, %p1595_p8 }
  0xc4   : > { %v1443_v40 = vld [vmem:[#allocation10 + $0x28] sm:$0xff]   ;;  %v1445_v42 = vld [vmem:[#allocation10 + $0x30] sm:$0xff]   ;;  %v1446_v43 = vld [vmem:[#allocation10 + $0x78] sm:$0xff]  }
  0xc5   : > { %v1447_v44 = vld [vmem:[#allocation10 + $0x38] sm:$0xff]  }
  0xc6   : > { %1209 = vmatpush3.bf16.msra.mxu0 %v1414_v7  ;;  %1221 = vmatpush3.bf16.msra.mxu1 %v1415_v9 }
  0xc7   : > { %1226 = vmatprep.subr.bf16.mxu0 %v1695_v0  ;;  %1246 = vmatprep.subr.bf16.mxu1 %v1695_v0 }
  0xc9   : > { %1211 = vmatmul.mubr.msk.bf16.vlgmr.msra.gmra.mrb[0].mxu0 %vm392_vm1, %v357_v10  ;;  %1223 = vmatmul.mubr.msk.bf16.vlgmr.msra.gmra.mrb[0].mxu1 %vm392_vm1, %v357_v10 }
  0xca   : > { %1227 = vmatpush3.bf16.msra.mxu0 %v1416_v11  ;;  %1247 = vmatpush3.bf16.msra.mxu1 %v1417_v12 }
  0xcb   : > { %1228 = vmatprep.subr.bf16.mxu0 %v1695_v0  ;;  %1248 = vmatprep.subr.bf16.mxu1 %v1695_v0 }
  0xcc   : > { %1242 = vmatprep.mubr.msk.bf16.mxu0 %vm1696_vm0, %v1695_v0  ;;  %1262 = vmatprep.mubr.msk.bf16.mxu1 %vm1696_vm0, %v1695_v0 }
  0xce   : > { %1229 = vmatpush3.bf16.msra.mxu0 %v1418_v13  ;;  %1249 = vmatpush3.bf16.msra.mxu1 %v1419_v14 }
  0xcf   : > { %1230 = vmatprep.subr.bf16.mxu0 %v1695_v0  ;;  %1250 = vmatprep.subr.bf16.mxu1 %v1695_v0 }
  0xd2   : > { %1231 = vmatpush3.bf16.msra.mxu0 %v1420_v15  ;;  %1251 = vmatpush3.bf16.msra.mxu1 %v1421_v16 }
  0xd3   : > { %1232 = vmatprep.subr.bf16.mxu0 %v1695_v0  ;;  %1252 = vmatprep.subr.bf16.mxu1 %v1695_v0 }
  0xd6   : > { %1233 = vmatpush3.bf16.msra.mxu0 %v1422_v17  ;;  %1253 = vmatpush3.bf16.msra.mxu1 %v1423_v18 }
  0xd7   : > { %1234 = vmatprep.subr.bf16.mxu0 %v1695_v0  ;;  %1254 = vmatprep.subr.bf16.mxu1 %v1695_v0 }
  0xda   : > { %1235 = vmatpush3.bf16.msra.mxu0 %v1424_v19  ;;  %1255 = vmatpush3.bf16.msra.mxu1 %v1425_v20 }
  0xdb   : > { %1236 = vmatprep.subr.bf16.mxu0 %v1695_v0  ;;  %1256 = vmatprep.subr.bf16.mxu1 %v1695_v0 }
  0xde   : > { %1237 = vmatpush3.bf16.msra.mxu0 %v1426_v21  ;;  %1257 = vmatpush3.bf16.msra.mxu1 %v1427_v22 }
  0xdf   : > { %1238 = vmatprep.subr.bf16.mxu0 %v1695_v0  ;;  %1258 = vmatprep.subr.bf16.mxu1 %v1695_v0 }
  0xe2   : > { %1239 = vmatpush3.bf16.msra.mxu0 %v1428_v23  ;;  %1259 = vmatpush3.bf16.msra.mxu1 %v1429_v24 }
  0xe3   : > { %1240 = vmatprep.subr.bf16.mxu0 %v1695_v0  ;;  %1260 = vmatprep.subr.bf16.mxu1 %v1695_v0 }
  0xe6   : > { %1241 = vmatpush3.bf16.msra.mxu0 %v1430_v25  ;;  %1261 = vmatpush3.bf16.msra.mxu1 %v1431_v27 }
  0xe7   : > { %1266 = vmatprep.subr.bf16.mxu0 %v1695_v0  ;;  %1286 = vmatprep.subr.bf16.mxu1 %v1695_v0 }
  0xe9   : > { %1243 = vmatmul.mubr.bf16.vlgmr.msra.gmra.mrb[4].mxu0 %v359_v28  ;;  %1263 = vmatmul.mubr.bf16.vlgmr.msra.gmra.mrb[4].mxu1 %v359_v28 }
  0xea   : > { %1282 = vmatprep.mubr.msk.bf16.mxu0 %vm1696_vm0, %v1695_v0  ;;  %1302 = vmatprep.mubr.msk.bf16.mxu1 %vm1696_vm0, %v1695_v0 }
  0xeb   : > { %1267 = vmatpush3.bf16.msra.mxu0 %v1432_v29  ;;  %1287 = vmatpush3.bf16.msra.mxu1 %v1433_v30 }
  0xec   : > { %1268 = vmatprep.subr.bf16.mxu0 %v1695_v0  ;;  %1288 = vmatprep.subr.bf16.mxu1 %v1695_v0 }
  0xef   : > { %1269 = vmatpush3.bf16.msra.mxu0 %v1434_v31  ;;  %1289 = vmatpush3.bf16.msra.mxu1 %v1435_v32 }
  0xf0   : > { %1270 = vmatprep.subr.bf16.mxu0 %v1695_v0  ;;  %1290 = vmatprep.subr.bf16.mxu1 %v1695_v0 }
  0xf3   : > { %1271 = vmatpush3.bf16.msra.mxu0 %v1436_v33  ;;  %1291 = vmatpush3.bf16.msra.mxu1 %v1437_v34 }
  0xf4   : > { %1272 = vmatprep.subr.bf16.mxu0 %v1695_v0  ;;  %1292 = vmatprep.subr.bf16.mxu1 %v1695_v0 }
  0xf7   : > { %1273 = vmatpush3.bf16.msra.mxu0 %v1438_v35  ;;  %1293 = vmatpush3.bf16.msra.mxu1 %v1439_v36 }
  0xf8   : > { %1274 = vmatprep.subr.bf16.mxu0 %v1695_v0  ;;  %1294 = vmatprep.subr.bf16.mxu1 %v1695_v0 }
  0xfb   : > { %1275 = vmatpush3.bf16.msra.mxu0 %v1440_v37  ;;  %1295 = vmatpush3.bf16.msra.mxu1 %v1441_v38 }
  0xfc   : > { %1276 = vmatprep.subr.bf16.mxu0 %v1695_v0  ;;  %1296 = vmatprep.subr.bf16.mxu1 %v1695_v0 }
  0xff   : > { %1277 = vmatpush3.bf16.msra.mxu0 %v1442_v39  ;;  %1297 = vmatpush3.bf16.msra.mxu1 %v1443_v40 }
 0x100   : > { %1278 = vmatprep.subr.bf16.mxu0 %v1695_v0  ;;  %1298 = vmatprep.subr.bf16.mxu1 %v1695_v0 }
 0x103   : > { %1279 = vmatpush3.bf16.msra.mxu0 %v1444_v41  ;;  %1299 = vmatpush3.bf16.msra.mxu1 %v1445_v42 }
 0x104   : > { %1280 = vmatprep.subr.bf16.mxu0 %v1695_v0  ;;  %1300 = vmatprep.subr.bf16.mxu1 %v1695_v0 }
 0x107   : > { %1281 = vmatpush3.bf16.msra.mxu0 %v1446_v43  ;;  %1301 = vmatpush3.bf16.msra.mxu1 %v1447_v44 }
 0x19c   : > { %v430_v45 = vpop.f32.mrb[0].mxu0  ;;  %v503_v46 = vpop.f32.mrb[0].mxu1 }
 0x19d   : > { %v1212_v47 = vpop.f32.mrb[1].mxu0  ;;  %v1224_v48 = vpop.f32.mrb[1].mxu1 }
 0x19e   : > { %v433_v49 = vpop.f32.mrb[2].mxu0  ;;  %v506_v50 = vpop.f32.mrb[2].mxu1 }
 0x19f   : > { %v1213_v51 = vpop.f32.mrb[3].mxu0  ;;  %v1225_v52 = vpop.f32.mrb[3].mxu1 }
 0x1bc   : > { %v607_v53 = vpop.f32.mrb[4].mxu0  ;;  %v712_v56 = vpop.f32.mrb[4].mxu1 }
 0x1bd   : > { %v718_v54 = vmul.f32 %v607_v53, %v430_v45  ;;  %v723_v55 = vmul.f32 %v607_v53, %v503_v46  ;;  %v1244_v57 = vpop.f32.mrb[5].mxu0  ;;  %v719_v58 = vmul.f32 %v712_v56, %v503_v46  ;;  %v722_v59 = vmul.f32 %v712_v56, %v430_v45  ;;  %v1264_v60 = vpop.f32.mrb[5].mxu1 }
 0x1be   : > { %v610_v61 = vpop.f32.mrb[6].mxu0  ;;  %v715_v62 = vpop.f32.mrb[6].mxu1 }
 0x1bf   : > { %v1245_v63 = vpop.f32.mrb[7].mxu0  ;;  %v720_v0 = vsub.f32 %v718_v54, %v719_v58  ;;  %v724_v1 = vadd.f32 %v723_v55, %v722_v59  ;;  %v1265_v2 = vpop.f32.mrb[7].mxu1 }
 0x1c1   : > { %v721_v3 = vpack.c.bf16 %v720_v0, %v720_v0  ;;  %v725_v4 = vpack.c.bf16 %v724_v1, %v724_v1 }
 0x1c3   : > { %1283 = vmatmul.mubr.bf16.vlgmr.msra.gmra.mrb[8].mxu0 %v725_v4  ;;  %1303 = vmatmul.mubr.bf16.vlgmr.msra.gmra.mrb[8].mxu1 %v721_v3 }
 0x296   : > { %v841_v5 = vpop.f32.mrb[8].mxu0  ;;  %v929_v6 = vpop.f32.mrb[8].mxu1 }
 0x297   : > { %v930_v7 = vadd.f32 %v929_v6, %v841_v5  ;;  %v1284_v8 = vpop.f32.mrb[9].mxu0  ;;  %v1304_v9 = vpop.f32.mrb[9].mxu1 }
 0x298   : > { %v844_v10 = vpop.f32.mrb[10].mxu0  ;;  %v932_v11 = vpop.f32.mrb[10].mxu1 }
 0x299   : > { %v1285_v12 = vpop.f32.mrb[11].mxu0  ;;  %v1305_v13 = vpop.f32.mrb[11].mxu1  ;;  %942 = vst [vmem:[%s353_s26] sm:$0xff] %v930_v7 }
 0x29a   : > { %1605 = shalt.err (!%p1602_p5)
}
 0x29b   : > { %s1606_s29 = scalar_lea.hbm %s2056_s2, 128  ;;  %s1610_s3 = scalar_lea.hbm %s2110_s5, 256 }
 0x29c   : > { %p1607_p6 = scmp.ne.s32.totalorder %s2056_s2, %s1606_s29  ;;  %p1611_p12 = scmp.lt.u32.totalorder %s2056_s2, %s2110_s5 }
 0x29d   : > { %p1612_p11 = scmp.lt.u32.totalorder %s1610_s3, %s1606_s29  ;;  %p1614_p0 = scmp.lt.u32.totalorder %s1606_s29, %s2056_s2 }
 0x29e   : > { %p1608_p10 = pnand %p1607_p6, %p2137_p2 }
 0x29f   : > { %p1613_p9 = por %p1612_p11, %p1611_p12 }
 0x2a0   : > { %p1609_p7 = pneg %p1608_p10 }
 0x2a1   : > { %p1615_p4 = por %p1614_p0, %p1613_p9 }
 0x2a3   : > { %p1616_p8 = pnand %p1615_p4, %p1609_p7 }
 0x2a5   : > { %1619 = shalt.err (!%p1616_p8)
}
 0x2a6   : > { %1322 = dma.vmem_to_hbm [thread:$0]  (%p2137_p2), %s2058_s27, 128, %s2056_s2, %s944_s21  }
 0x2a7 PF: > { %s2138_s28 = sld [smem:[#allocation17_spill]]  ;;  %s969_s30 = sand.u32 1, %s1666_s18  }
 0x2a8   : > { %p2140_p13 = scmp.ge.s32.totalorder %s1686_s23, 2  ;;  %s970_s16 = scalar_lea.sflag [#allocation4], %s969_s30 }
 0x2ad   : > { %p2139_p1 = scmp.ne.s32.totalorder %s2138_s28, 0 }
 0x2af   : > { %p1342_p3 = pnand %p2140_p13, %p2139_p1 }
 0x2b1   : > { %1661 = dma.done.wait (!%p1342_p3), %s970_s16, 128  }
 0x2b2   : > { %1663 = vsyncadd (!%p1342_p3), %s970_s16, 4294967168  ;;  %s25_s23 = sadd.s32 1, %s1686_s23   ;;  %s2141_s18 = smov %s1670_s19 }
 0x2b3   : > { %p22_p5 = scmp.ge.s32.totalorder %s25_s23, 4   ;;  %s2142_s19 = smov %s1674_s20 }
 0x2b4   : > { %s2143_s20 = smov %s1898_s9  ;;  %s2144_s21 = smov %s1682_s22 }
 0x2b5   : > { %s2145_s22 = smov %s2147_s6  ;;  %24 = sbr.rel (!%p22_p5) target bundleno = 13 (0xd), region = 120 }
 0x2bc   :  { %975 = vsyncpa [#allocation3], 1 }
 0x2bd   :  { %977 = vsyncpa [#allocation3 + $0x1], 1 }
 0x2be   :  { %978 = vsyncpa [#allocation6], 1 }
 0x2bf   :  { %980 = vsyncpa [#allocation6 + $0x1], 1 }
 0x2c0   :  { %981 = vsyncpa [#allocation9], 1 }
 0x2c1   :  { %982 = vsyncpa [#allocation4], 1 }
 0x2c2   :  { %984 = vsyncpa [#allocation4 + $0x1], 1 }

// kernel: tpu_custom_call.1
= control target key start
LH: loop header
LB: loop body
LE: loop exit
PB: predicated region body
PF: predicated region fallthrough
CT: control target
= control target key end

     0   :  { %s2105_s0 = inlined_call_operand.hbm [shape: f32[16,64], index: 0, kind: input, shape index: {}]   ;;  %s2106_s1 = inlined_call_operand.hbm [shape: f32[16,128], index: 1, kind: input, shape index: {}]   ;;  %s2107_s2 = inlined_call_operand.hbm [shape: bf16[2,64,128], index: 2, kind: input, shape index: {}]   ;;  %s2108_s3 = inlined_call_operand.hbm [shape: bf16[2,128,128], index: 3, kind: input, shape index: {}]   ;;  %s2109_s4 = inlined_call_operand.hbm [shape: bf16[2,128,128], index: 4, kind: input, shape index: {}]   ;;  %s2110_s5 = inlined_call_operand.hbm [shape: f32[16,128], index: 5, kind: output, shape index: {}]  }
   0x1   :  { %2116 = sst [smem:[#allocation18_spill]] %s2107_s2 }
   0x2   :  { %2117 = sst [smem:[#allocation19_spill]] %s2108_s3 }
   0x3   :  { %2118 = sst [smem:[#allocation20_spill]] %s2109_s4 }
   0x4   :  { %10 = vsyncpa [#allocation3], 0 }
   0x5   :  { %12 = vsyncpa [#allocation3 + $0x1], 0 }
   0x6   :  { %13 = vsyncpa [#allocation6], 0 }
   0x7   :  { %15 = vsyncpa [#allocation6 + $0x1], 0 }
   0x8   :  { %16 = vsyncpa [#allocation9], 0 }
   0x9   :  { %17 = vsyncpa [#allocation4], 0 }
   0xa   :  { %19 = vsyncpa [#allocation4 + $0x1], 0  ;;  %s1728_s18 = smov 0   ;;  %s1730_s19 = smov 0  }
   0xb   :  { %s1732_s20 = smov 0   ;;  %s1734_s21 = smov 0  }
   0xc   :  { %s1736_s22 = smov 0   ;;  %s1738_s23 = smov 0  }
   0xd LB: > { %s1759_s24 = sadd.s32 4294967295, %s1686_s23   ;;  %s1093_s25 = sadd.s32 4294967294, %s1686_s23   ;;  %s1686_s23 = sphi %s1738_s23, %s25_s23   ;;  %s1682_s22 = sphi %s1736_s22, %s2145_s22   ;;  %s1678_s21 = sphi %s1734_s21, %s2144_s21   ;;  %s1674_s20 = sphi %s1732_s20, %s2143_s20   ;;  %s1670_s19 = sphi %s1730_s19, %s2142_s19   ;;  %s1666_s18 = sphi %s1728_s18, %s2141_s18  }
   0xe   : > { %p57_p0 = scmp.ne.s32.totalorder %s1670_s19, %s1666_s18  ;;  %p2111_p1 = scmp.eq.s32.totalorder %s1759_s24, 0 }
   0xf   : > { %p191_p3 = scmp.eq.s32.totalorder %s1093_s25, 1  ;;  %p1094_p5 = scmp.ge.s32.totalorder %s1686_s23, 1 }
  0x10   : > { %p1768_p4 = por %p2111_p1, %p57_p0  ;;  %p198_p7 = scmp.lt.s32.totalorder %s1686_s23, 3 }
  0x11   : > { %p1773_p6 = por %p191_p3, %p57_p0  ;;  %s1688_s29 = smov [#allocation7]  }
  0x12   : > { %s2119_s26 = scalar_select %p1768_p4, 1, 0 }
  0x13   : > { %s2120_s27 = scalar_select %p1773_p6, 1, 0 }
  0x14   : > { %p1778_p8 = pnand %p1094_p5, %p198_p7  ;;  %s212_s30 = sshll.u32 %s1688_s29, 4  ;;  %s1782_s30 = int_to_ptr.vmem [resolvable:$true] %s212_s30 }
  0x15   : > { %2121 = sst [smem:[#allocation17_spill]] %s2120_s27  ;;  %s1689_s7 = smov [#allocation8]  }
  0x16   : > { %s2122_s28 = scalar_select %p1778_p8, 1, 0 }
  0x17   : > { %p1324_p9 = pneg %p1778_p8  ;;  %s227_s8 = sshll.u32 %s1689_s7, 4  ;;  %s1793_s8 = int_to_ptr.vmem [resolvable:$true] %s227_s8 }
  0x18   : > { %s1690_s9 = smov [#allocation10]   ;;  %s2124_s2 = sld [smem:[#allocation18_spill]] }
  0x19   : > { %p1789_p11 = pnand %p1324_p9, %p2111_p1  ;;  %s1795_s10 = sshll.u32 %s1690_s9, 4  ;;  %s244_s10 = int_to_ptr.vmem [resolvable:$true] %s1795_s10 }
  0x1b   : > { %p1805_p13 = pneg %p1789_p11 }
  0x1e   : > { %s1448_s13 = scalar_lea.hbm %s2124_s2, 1024 }
  0x1f   : > { %p1449_p12 = scmp.ne.s32.totalorder %s2124_s2, %s1448_s13  ;;  %p1455_p5 = scmp.lt.u32.totalorder %s1448_s13, %s2124_s2 }
  0x21   : > { %p1451_p0 = pnand %p1805_p13, %p1449_p12 }
  0x23   : > { %p1452_p3 = pneg %p1451_p0 }
  0x25   : > { %p1457_p7 = pnand %p1455_p5, %p1452_p3 }
  0x27   : > { %1460 = shalt.err (!%p1457_p7)
}
  0x28   : > { %s1461_s29 = scalar_lea.vmem %s1782_s30, 1024  ;;  %p1469_p2 = scmp.lt.s32.totalorder %s1782_s30, %s1782_s30 }
  0x29   : > { %p1462_p9 = scmp.ne.s32.totalorder %s1782_s30, %s1461_s29  ;;  %p1470_p6 = scmp.lt.s32.totalorder %s1461_s29, %s1461_s29 }
  0x2b   : > { %p1464_p10 = pnand %p1462_p9, %p1805_p13  ;;  %p1471_p12 = por %p1470_p6, %p1469_p2 }
  0x2d   : > { %p1465_p1 = pneg %p1464_p10 }
  0x2f   : > { %p1472_p0 = pnand %p1471_p12, %p1465_p1 }
  0x31   : > { %1475 = shalt.err (!%p1472_p0)
}
  0x32   : > { %s1691_s7 = smov 64   ;;  %s1692_s9 = smov 4  }
  0x33   : > { %1327 = dma.hbm_to_vmem [thread:$0]  (!%p1789_p11), %s2124_s2, 1024, %s1782_s30, [#allocation6], %s1691_s7, %s1691_s7, %s1692_s9  }
  0x34   : > { %s2126_s3 = sld [smem:[#allocation19_spill]] }
  0x3a   : > { %s1476_s15 = scalar_lea.hbm %s2126_s3, 2048 }
  0x3b   : > { %p1477_p1 = scmp.ne.s32.totalorder %s2126_s3, %s1476_s15  ;;  %p1483_p10 = scmp.lt.u32.totalorder %s1476_s15, %s2126_s3 }
  0x3d   : > { %p1479_p2 = pnand %p1477_p1, %p1805_p13 }
  0x3f   : > { %p1480_p6 = pneg %p1479_p2 }
  0x41   : > { %p1485_p3 = pnand %p1483_p10, %p1480_p6 }
  0x43   : > { %1488 = shalt.err (!%p1485_p3)
}
  0x44   : > { %s1489_s30 = scalar_lea.vmem %s1793_s8, 2048  ;;  %p1497_p12 = scmp.lt.s32.totalorder %s1793_s8, %s1793_s8 }
  0x45   : > { %p1490_p5 = scmp.ne.s32.totalorder %s1793_s8, %s1489_s30  ;;  %p1498_p0 = scmp.lt.s32.totalorder %s1489_s30, %s1489_s30 }
  0x47   : > { %p1492_p7 = pnand %p1490_p5, %p1805_p13  ;;  %p1499_p1 = por %p1498_p0, %p1497_p12 }
  0x49   : > { %p1493_p9 = pneg %p1492_p7 }
  0x4b   : > { %p1500_p2 = pnand %p1499_p1, %p1493_p9 }
  0x4d   : > { %1503 = shalt.err (!%p1500_p2)
}
  0x4e   : > { %1330 = dma.hbm_to_vmem [thread:$0]  (!%p1789_p11), %s2126_s3, 2048, %s1793_s8, [#allocation9], %s1691_s7, %s1691_s7, %s1692_s9  }
  0x4f   : > { %s2127_s4 = sld [smem:[#allocation20_spill]] }
  0x55   : > { %s1504_s14 = scalar_lea.hbm %s2127_s4, 2048 }
  0x56   : > { %p1505_p6 = scmp.ne.s32.totalorder %s2127_s4, %s1504_s14  ;;  %p1511_p5 = scmp.lt.u32.totalorder %s1504_s14, %s2127_s4 }
  0x58   : > { %p1507_p10 = pnand %p1505_p6, %p1805_p13 }
  0x5a   : > { %p1508_p3 = pneg %p1507_p10 }
  0x5c   : > { %p1513_p7 = pnand %p1511_p5, %p1508_p3 }
  0x5e   : > { %1516 = shalt.err (!%p1513_p7)
}
  0x5f   : > { %s1517_s30 = scalar_lea.vmem %s244_s10, 2048  ;;  %p1525_p1 = scmp.lt.s32.totalorder %s244_s10, %s244_s10 }
  0x60   : > { %p1518_p9 = scmp.ne.s32.totalorder %s244_s10, %s1517_s30  ;;  %p1526_p2 = scmp.lt.s32.totalorder %s1517_s30, %s1517_s30 }
  0x62   : > { %p1520_p12 = pnand %p1518_p9, %p1805_p13  ;;  %p1527_p4 = por %p1526_p2, %p1525_p1 }
  0x64   : > { %p1521_p0 = pneg %p1520_p12 }
  0x66   : > { %p1528_p8 = pnand %p1527_p4, %p1521_p0 }
  0x68   : > { %1531 = shalt.err (!%p1528_p8)
}
  0x69   : > { %1333 = dma.hbm_to_vmem [thread:$0]  (!%p1789_p11), %s2127_s4, 2048, %s244_s10, [#allocation9], %s1691_s7, %s1691_s7, %s1692_s9  }
  0x6a   : > { %s44_s16 = sadd.s32 1, %s1674_s20  ;;  %s37_s6 = sadd.s32 1, %s1682_s22 }
  0x6b   : > { %p51_p4 = scmp.ne.s32.totalorder %s1674_s20, %s1670_s19  ;;  %p39_p8 = scmp.ge.s32.totalorder %s37_s6, 2 }
  0x6c   : > { %p52_p13 = scmp.eq.s32.totalorder %s1686_s23, 0  ;;  %p2128_p6 = scmp.eq.s32.totalorder %s1759_s24, 1 }
  0x6d   : > { %p1348_p3 = scmp.lt.s32.totalorder %s1686_s23, 2  ;;  %s2147_s6 = smov (%p39_p8, %s37_s6), 0 }
  0x6e   : > { %p1884_p10 = por %p2128_p6, %p51_p4  ;;  %p53_p5 = por %p52_p13, %p51_p4 }
  0x6f   : > { %s257_s12 = sand.u32 1, %s1674_s20   ;;  %s41_s13 = ssub.s32 %s1682_s22, %s2147_s6 }
  0x70   : > { %s2129_s11 = scalar_select %p1884_p10, 1, 0 }
  0x71   : > { %p42_p11 = scmp.eq.s32.totalorder %s41_s13, 0  ;;  %s1894_s10 = sshll.u32 %s257_s12, 3 }
  0x72   : > { %s1100_s7 = sshll.u32 %s1682_s22, 7  ;;  %s261_s25 = scalar_lea.vmem [#allocation2], %s1894_s10 }
  0x73   : > { %s1898_s9 = scalar_select %p42_p11, %s1674_s20, %s44_s16  }
  0x74   : > { %s1903_s17 = scalar_lea.hbm %s2105_s0, %s1100_s7  ;;  %s268_s29 = sshll.u32 %s261_s25, 4  ;;  %s1906_s29 = int_to_ptr.vmem [resolvable:$true] %s268_s29 }
  0x75   : > { %p1910_p7 = pnand %p1348_p3, %p53_p5  ;;  %s1917_s16 = scalar_lea.hbm %s2106_s1, %s1100_s7 }
  0x76   : > { %s275_s13 = sand.u32 1, %s1686_s23   ;;  %s258_s14 = scalar_lea.sflag [#allocation3], %s257_s12 }
  0x77   : > { %s1532_s15 = scalar_lea.hbm %s1903_s17, 128  ;;  %p1534_p12 = pneg %p1910_p7 }
  0x78   : > { %p1533_p9 = scmp.ne.s32.totalorder %s1903_s17, %s1532_s15  ;;  %s1537_s3 = scalar_lea.hbm %s2105_s0, 256 }
  0x79   : > { %p1538_p2 = scmp.lt.u32.totalorder %s1903_s17, %s2105_s0  ;;  %p1539_p4 = scmp.lt.u32.totalorder %s1537_s3, %s1532_s15 }
  0x7a   : > { %p1535_p0 = pnand %p1534_p12, %p1533_p9  ;;  %p1541_p13 = scmp.lt.u32.totalorder %s1532_s15, %s1903_s17 }
  0x7b   : > { %p1540_p8 = por %p1539_p4, %p1538_p2 }
  0x7c   : > { %p1536_p1 = pneg %p1535_p0 }
  0x7d   : > { %p1542_p6 = por %p1541_p13, %p1540_p8 }
  0x7f   : > { %p1543_p3 = pnand %p1542_p6, %p1536_p1 }
  0x81   : > { %1546 = shalt.err (!%p1543_p3)
}
  0x82   : > { %s1547_s12 = scalar_lea.vmem %s1906_s29, 128  ;;  %s1693_s2 = smov [#allocation2]  }
  0x83   : > { %p1548_p5 = scmp.ne.s32.totalorder %s1906_s29, %s1547_s12  ;;  %s1552_s7 = sshll.u32 %s1693_s2, 4  ;;  %s1553_s7 = int_to_ptr.vmem [resolvable:$false] %s1552_s7 }
  0x84   : > { %s1554_s4 = scalar_lea.vmem %s1553_s7, 256  ;;  %p1555_p0 = scmp.lt.s32.totalorder %s1906_s29, %s1553_s7 }
  0x85   : > { %p1550_p11 = pnand %p1548_p5, %p1534_p12  ;;  %p1556_p2 = scmp.lt.s32.totalorder %s1554_s4, %s1547_s12 }
  0x87   : > { %p1551_p9 = pneg %p1550_p11  ;;  %p1557_p4 = por %p1556_p2, %p1555_p0 }
  0x89   : > { %p1558_p8 = pnand %p1557_p4, %p1551_p9 }
  0x8b   : > { %1561 = shalt.err (!%p1558_p8)
}
  0x8c   : > { %1337 = dma.hbm_to_vmem [thread:$0]  (!%p1910_p7), %s1903_s17, 128, %s1906_s29, %s258_s14  }
  0x8d   : > { %s279_s3 = scalar_lea.vmem [#allocation5], %s1894_s10  ;;  %s276_s15 = scalar_lea.sflag [#allocation6], %s275_s13 }
  0x8e   : > { %s286_s27 = sshll.u32 %s279_s3, 4  ;;  %s1562_s25 = scalar_lea.hbm %s1917_s16, 128  ;;  %s287_s27 = int_to_ptr.vmem [resolvable:$true] %s286_s27 }
  0x8f   : > { %p1563_p1 = scmp.ne.s32.totalorder %s1917_s16, %s1562_s25  ;;  %s1567_s2 = scalar_lea.hbm %s2106_s1, 256 }
  0x90   : > { %p1568_p3 = scmp.lt.u32.totalorder %s1917_s16, %s2106_s1  ;;  %p1569_p5 = scmp.lt.u32.totalorder %s1567_s2, %s1562_s25 }
  0x91   : > { %p1565_p13 = pnand %p1563_p1, %p1534_p12  ;;  %p1571_p9 = scmp.lt.u32.totalorder %s1562_s25, %s1917_s16 }
  0x92   : > { %p1570_p11 = por %p1569_p5, %p1568_p3 }
  0x93   : > { %p1566_p6 = pneg %p1565_p13 }
  0x94   : > { %p1572_p0 = por %p1571_p9, %p1570_p11 }
  0x96   : > { %p1573_p2 = pnand %p1572_p0, %p1566_p6 }
  0x98   : > { %1576 = shalt.err (!%p1573_p2)
}
  0x99   : > { %s1577_s10 = scalar_lea.vmem %s287_s27, 128  ;;  %s1694_s17 = smov [#allocation5]  }
  0x9a   : > { %p1578_p4 = scmp.ne.s32.totalorder %s287_s27, %s1577_s10  ;;  %s1582_s29 = sshll.u32 %s1694_s17, 4  ;;  %s1583_s29 = int_to_ptr.vmem [resolvable:$false] %s1582_s29 }
  0x9b   : > { %s1584_s13 = scalar_lea.vmem %s1583_s29, 256  ;;  %p1585_p13 = scmp.lt.s32.totalorder %s287_s27, %s1583_s29 }
  0x9c   : > { %p1580_p8 = pnand %p1578_p4, %p1534_p12  ;;  %p1586_p10 = scmp.lt.s32.totalorder %s1584_s13, %s1577_s10 }
  0x9e   : > { %p1581_p1 = pneg %p1580_p8  ;;  %p1587_p3 = por %p1586_p10, %p1585_p13 }
  0xa0   : > { %p1588_p5 = pnand %p1587_p3, %p1581_p1 }
  0xa2   : > { %1591 = shalt.err (!%p1588_p5)
}
  0xa3   : > { %1340 = dma.hbm_to_vmem [thread:$0]  (!%p1910_p7), %s1917_s16, 128, %s287_s27, %s276_s15  }
  0xa4   : > { %p2131_p6 = scmp.ne.s32.totalorder %s2122_s28, 0 }
  0xa5   : > { %s1970_s14 = sand.u32 (!%p2131_p6), 1, %s1670_s19   ;;  %p2132_p10 = scmp.ne.s32.totalorder (!%p2131_p6), %s2119_s26, 0 }
  0xa6   : > { %295 = sbr.rel (%p2131_p6) target bundleno = 679 (0x2a7), region = 40  ;;  %s1973_s3 = sshll.u32 (!%p2131_p6), %s1970_s14, 3 }
  0xa7   : > { %s298_s25 = scalar_lea.sflag (!%p2131_p6), [#allocation3], %s1970_s14  ;;  %s301_s8 = scalar_lea.vmem (!%p2131_p6), [#allocation2], %s1973_s3 }
  0xad   : > { %1645 = dma.done.wait (%p2132_p10), %s298_s25, 128  }
  0xae   : > { %1647 = vsyncadd (%p2132_p10), %s298_s25, 4294967168  ;;  %s306_s28 = sand.u32 1, %s1759_s24   ;;  %s310_s16 = scalar_lea.vmem [#allocation5], %s1973_s3 }
  0xaf   : > { %s307_s30 = scalar_lea.sflag [#allocation6], %s306_s28 }
  0xb0   : > { %1649 = dma.done.wait (%p2132_p10), %s307_s30, 128  }
  0xb1   : > { %1651 = vsyncadd (%p2132_p10), %s307_s30, 4294967168  ;;  %p2133_p7 = scmp.eq.s32.totalorder %s1759_s24, 0 }
  0xb3   : > { %1653 = dma.done.wait (%p2133_p7), [#allocation6], 1024   ;;  %p2134_p12 = pmov %p2133_p7 }
  0xb4   : > { %p2135_p11 = pmov %p2133_p7 }
  0xb5   : > { %1655 = vsyncadd (%p2134_p12), [#allocation6], 4294966272 }
  0xb6   : > { %1657 = dma.done.wait (%p2135_p11), [#allocation9], 4096   ;;  %p2136_p9 = pmov %p2133_p7 }
  0xb7   : > { %v1695_v0 = vmov 0.0   ;;  %vm1696_vm0 = vmmov 0   ;;  %v1408_v1 = vld [vmem:[#allocation7] sm:$0xff]   ;;  %v1410_v3 = vld [vmem:[#allocation7 + $0x8] sm:$0xff]   ;;  %v1412_v5 = vld [vmem:[#allocation7 + $0x10] sm:$0xff]   ;;  %vm392_vm1 = vcmask 523264  }
  0xb8   : > { %1659 = vsyncadd (%p2136_p9), [#allocation9], 4294963200  ;;  %1202 = vmatprep.subr.bf16.mxu0 %v1695_v0  ;;  %1214 = vmatprep.subr.bf16.mxu1 %v1695_v0  ;;  %v1409_v2 = vld [vmem:[#allocation7 + $0x20] sm:$0xff]   ;;  %v1411_v4 = vld [vmem:[#allocation7 + $0x28] sm:$0xff]   ;;  %s1153_s24 = sshll.u32 %s1678_s21, 7  ;;  %s353_s26 = scalar_lea.vmem [#allocation11], %s1973_s3 }
  0xb9   : > { %1210 = vmatprep.mubr.msk.bf16.mxu0 %vm1696_vm0, %v1695_v0  ;;  %1222 = vmatprep.mubr.msk.bf16.mxu1 %vm1696_vm0, %v1695_v0  ;;  %v1413_v6 = vld [vmem:[#allocation7 + $0x30] sm:$0xff]   ;;  %v1414_v7 = vld [vmem:[#allocation7 + $0x18] sm:$0xff]   ;;  %v356_v8 = vld [vmem:[%s301_s8] sm:$0xff]  ;;  %s957_s27 = sshll.u32 %s353_s26, 4  ;;  %s2056_s2 = scalar_lea.hbm %s2110_s5, %s1153_s24  ;;  %s2058_s27 = int_to_ptr.vmem [resolvable:$true] %s957_s27 }
  0xba   : > { %1203 = vmatpush3.bf16.msra.mxu0 %v1408_v1  ;;  %1215 = vmatpush3.bf16.msra.mxu1 %v1409_v2  ;;  %v1415_v9 = vld [vmem:[#allocation7 + $0x38] sm:$0xff]   ;;  %v357_v10 = vpack.c.bf16 %v356_v8, %v356_v8  ;;  %v1416_v11 = vld [vmem:[#allocation8] sm:$0xff]   ;;  %v1418_v13 = vld [vmem:[#allocation8 + $0x8] sm:$0xff]   ;;  %s944_s21 = scalar_lea.sflag [#allocation4], %s1970_s14  ;;  %s1592_s7 = scalar_lea.vmem %s2058_s27, 128 }
  0xbb   : > { %1204 = vmatprep.subr.bf16.mxu0 %v1695_v0  ;;  %1216 = vmatprep.subr.bf16.mxu1 %v1695_v0  ;;  %v1417_v12 = vld [vmem:[#allocation8 + $0x40] sm:$0xff]   ;;  %v1419_v14 = vld [vmem:[#allocation8 + $0x48] sm:$0xff]   ;;  %v1420_v15 = vld [vmem:[#allocation8 + $0x10] sm:$0xff]   ;;  %p1593_p0 = scmp.ne.s32.totalorder %s2058_s27, %s1592_s7  ;;  %p2137_p2 = scmp.ne.s32.totalorder %s2129_s11, 0 }
  0xbc   : > { %v1421_v16 = vld [vmem:[#allocation8 + $0x50] sm:$0xff]   ;;  %v1422_v17 = vld [vmem:[#allocation8 + $0x18] sm:$0xff]   ;;  %v1424_v19 = vld [vmem:[#allocation8 + $0x20] sm:$0xff]   ;;  %s1697_s4 = smov [#allocation11]  }
  0xbd   : > { %v1423_v18 = vld [vmem:[#allocation8 + $0x58] sm:$0xff]   ;;  %v1425_v20 = vld [vmem:[#allocation8 + $0x60] sm:$0xff]   ;;  %v1426_v21 = vld [vmem:[#allocation8 + $0x28] sm:$0xff]   ;;  %p1594_p4 = pnand %p1593_p0, %p2137_p2  ;;  %s1596_s10 = sshll.u32 %s1697_s4, 4  ;;  %s1597_s10 = int_to_ptr.vmem [resolvable:$false] %s1596_s10 }
  0xbe   : > { %1205 = vmatpush3.bf16.msra.mxu0 %v1410_v3  ;;  %1217 = vmatpush3.bf16.msra.mxu1 %v1411_v4  ;;  %v1427_v22 = vld [vmem:[#allocation8 + $0x68] sm:$0xff]   ;;  %v1428_v23 = vld [vmem:[#allocation8 + $0x30] sm:$0xff]   ;;  %v1430_v25 = vld [vmem:[#allocation8 + $0x38] sm:$0xff]   ;;  %s1598_s17 = scalar_lea.vmem %s1597_s10, 256  ;;  %p1599_p1 = scmp.lt.s32.totalorder %s2058_s27, %s1597_s10 }
  0xbf   : > { %1206 = vmatprep.subr.bf16.mxu0 %v1695_v0  ;;  %1218 = vmatprep.subr.bf16.mxu1 %v1695_v0  ;;  %v1429_v24 = vld [vmem:[#allocation8 + $0x70] sm:$0xff]   ;;  %v1431_v27 = vld [vmem:[#allocation8 + $0x78] sm:$0xff]   ;;  %v1432_v29 = vld [vmem:[#allocation10 + $0x40] sm:$0xff]   ;;  %p1595_p8 = pneg %p1594_p4  ;;  %p1600_p13 = scmp.lt.s32.totalorder %s1598_s17, %s1592_s7 }
  0xc0   : > { %v358_v26 = vld [vmem:[%s310_s16] sm:$0xff]  ;;  %v1433_v30 = vld [vmem:[#allocation10] sm:$0xff]   ;;  %v1434_v31 = vld [vmem:[#allocation10 + $0x48] sm:$0xff]  }
  0xc1   : > { %v359_v28 = vpack.c.bf16 %v358_v26, %v358_v26  ;;  %v1435_v32 = vld [vmem:[#allocation10 + $0x8] sm:$0xff]   ;;  %v1436_v33 = vld [vmem:[#allocation10 + $0x50] sm:$0xff]   ;;  %v1438_v35 = vld [vmem:[#allocation10 + $0x58] sm:$0xff]   ;;  %p1601_p3 = por %p1600_p13, %p1599_p1 }
  0xc2   : > { %1207 = vmatpush3.bf16.msra.mxu0 %v1412_v5  ;;  %1219 = vmatpush3.bf16.msra.mxu1 %v1413_v6  ;;  %v1437_v34 = vld [vmem:[#allocation10 + $0x10] sm:$0xff]   ;;  %v1439_v36 = vld [vmem:[#allocation10 + $0x18] sm:$0xff]   ;;  %v1440_v37 = vld [vmem:[#allocation10 + $0x60] sm:$0xff]  }
  0xc3   : > { %1208 = vmatprep.subr.bf16.mxu0 %v1695_v0  ;;  %1220 = vmatprep.subr.bf16.mxu1 %v1695_v0  ;;  %v1441_v38 = vld [vmem:[#allocation10 + $0x20] sm:$0xff]   ;;  %v1442_v39 = vld [vmem:[#allocation10 + $0x68] sm:$0xff]   ;;  %v1444_v41 = vld [vmem:[#allocation10 + $0x70] sm:$0xff]   ;;  %p1602_p5 = pnand %p1601_p3, %p1595_p8 }
  0xc4   : > { %v1443_v40 = vld [vmem:[#allocation10 + $0x28] sm:$0xff]   ;;  %v1445_v42 = vld [vmem:[#allocation10 + $0x30] sm:$0xff]   ;;  %v1446_v43 = vld [vmem:[#allocation10 + $0x78] sm:$0xff]  }
  0xc5   : > { %v1447_v44 = vld [vmem:[#allocation10 + $0x38] sm:$0xff]  }
  0xc6   : > { %1209 = vmatpush3.bf16.msra.mxu0 %v1414_v7  ;;  %1221 = vmatpush3.bf16.msra.mxu1 %v1415_v9 }
  0xc7   : > { %1226 = vmatprep.subr.bf16.mxu0 %v1695_v0  ;;  %1246 = vmatprep.subr.bf16.mxu1 %v1695_v0 }
  0xc9   : > { %1211 = vmatmul.mubr.msk.bf16.vlgmr.msra.gmra.mrb[0].mxu0 %vm392_vm1, %v357_v10  ;;  %1223 = vmatmul.mubr.msk.bf16.vlgmr.msra.gmra.mrb[0].mxu1 %vm392_vm1, %v357_v10 }
  0xca   : > { %1227 = vmatpush3.bf16.msra.mxu0 %v1416_v11  ;;  %1247 = vmatpush3.bf16.msra.mxu1 %v1417_v12 }
  0xcb   : > { %1228 = vmatprep.subr.bf16.mxu0 %v1695_v0  ;;  %1248 = vmatprep.subr.bf16.mxu1 %v1695_v0 }
  0xcc   : > { %1242 = vmatprep.mubr.msk.bf16.mxu0 %vm1696_vm0, %v1695_v0  ;;  %1262 = vmatprep.mubr.msk.bf16.mxu1 %vm1696_vm0, %v1695_v0 }
  0xce   : > { %1229 = vmatpush3.bf16.msra.mxu0 %v1418_v13  ;;  %1249 = vmatpush3.bf16.msra.mxu1 %v1419_v14 }
  0xcf   : > { %1230 = vmatprep.subr.bf16.mxu0 %v1695_v0  ;;  %1250 = vmatprep.subr.bf16.mxu1 %v1695_v0 }
  0xd2   : > { %1231 = vmatpush3.bf16.msra.mxu0 %v1420_v15  ;;  %1251 = vmatpush3.bf16.msra.mxu1 %v1421_v16 }
  0xd3   : > { %1232 = vmatprep.subr.bf16.mxu0 %v1695_v0  ;;  %1252 = vmatprep.subr.bf16.mxu1 %v1695_v0 }
  0xd6   : > { %1233 = vmatpush3.bf16.msra.mxu0 %v1422_v17  ;;  %1253 = vmatpush3.bf16.msra.mxu1 %v1423_v18 }
  0xd7   : > { %1234 = vmatprep.subr.bf16.mxu0 %v1695_v0  ;;  %1254 = vmatprep.subr.bf16.mxu1 %v1695_v0 }
  0xda   : > { %1235 = vmatpush3.bf16.msra.mxu0 %v1424_v19  ;;  %1255 = vmatpush3.bf16.msra.mxu1 %v1425_v20 }
  0xdb   : > { %1236 = vmatprep.subr.bf16.mxu0 %v1695_v0  ;;  %1256 = vmatprep.subr.bf16.mxu1 %v1695_v0 }
  0xde   : > { %1237 = vmatpush3.bf16.msra.mxu0 %v1426_v21  ;;  %1257 = vmatpush3.bf16.msra.mxu1 %v1427_v22 }
  0xdf   : > { %1238 = vmatprep.subr.bf16.mxu0 %v1695_v0  ;;  %1258 = vmatprep.subr.bf16.mxu1 %v1695_v0 }
  0xe2   : > { %1239 = vmatpush3.bf16.msra.mxu0 %v1428_v23  ;;  %1259 = vmatpush3.bf16.msra.mxu1 %v1429_v24 }
  0xe3   : > { %1240 = vmatprep.subr.bf16.mxu0 %v1695_v0  ;;  %1260 = vmatprep.subr.bf16.mxu1 %v1695_v0 }
  0xe6   : > { %1241 = vmatpush3.bf16.msra.mxu0 %v1430_v25  ;;  %1261 = vmatpush3.bf16.msra.mxu1 %v1431_v27 }
  0xe7   : > { %1266 = vmatprep.subr.bf16.mxu0 %v1695_v0  ;;  %1286 = vmatprep.subr.bf16.mxu1 %v1695_v0 }
  0xe9   : > { %1243 = vmatmul.mubr.bf16.vlgmr.msra.gmra.mrb[4].mxu0 %v359_v28  ;;  %1263 = vmatmul.mubr.bf16.vlgmr.msra.gmra.mrb[4].mxu1 %v359_v28 }
  0xea   : > { %1282 = vmatprep.mubr.msk.bf16.mxu0 %vm1696_vm0, %v1695_v0  ;;  %1302 = vmatprep.mubr.msk.bf16.mxu1 %vm1696_vm0, %v1695_v0 }
  0xeb   : > { %1267 = vmatpush3.bf16.msra.mxu0 %v1432_v29  ;;  %1287 = vmatpush3.bf16.msra.mxu1 %v1433_v30 }
  0xec   : > { %1268 = vmatprep.subr.bf16.mxu0 %v1695_v0  ;;  %1288 = vmatprep.subr.bf16.mxu1 %v1695_v0 }
  0xef   : > { %1269 = vmatpush3.bf16.msra.mxu0 %v1434_v31  ;;  %1289 = vmatpush3.bf16.msra.mxu1 %v1435_v32 }
  0xf0   : > { %1270 = vmatprep.subr.bf16.mxu0 %v1695_v0  ;;  %1290 = vmatprep.subr.bf16.mxu1 %v1695_v0 }
  0xf3   : > { %1271 = vmatpush3.bf16.msra.mxu0 %v1436_v33  ;;  %1291 = vmatpush3.bf16.msra.mxu1 %v1437_v34 }
  0xf4   : > { %1272 = vmatprep.subr.bf16.mxu0 %v1695_v0  ;;  %1292 = vmatprep.subr.bf16.mxu1 %v1695_v0 }
  0xf7   : > { %1273 = vmatpush3.bf16.msra.mxu0 %v1438_v35  ;;  %1293 = vmatpush3.bf16.msra.mxu1 %v1439_v36 }
  0xf8   : > { %1274 = vmatprep.subr.bf16.mxu0 %v1695_v0  ;;  %1294 = vmatprep.subr.bf16.mxu1 %v1695_v0 }
  0xfb   : > { %1275 = vmatpush3.bf16.msra.mxu0 %v1440_v37  ;;  %1295 = vmatpush3.bf16.msra.mxu1 %v1441_v38 }
  0xfc   : > { %1276 = vmatprep.subr.bf16.mxu0 %v1695_v0  ;;  %1296 = vmatprep.subr.bf16.mxu1 %v1695_v0 }
  0xff   : > { %1277 = vmatpush3.bf16.msra.mxu0 %v1442_v39  ;;  %1297 = vmatpush3.bf16.msra.mxu1 %v1443_v40 }
 0x100   : > { %1278 = vmatprep.subr.bf16.mxu0 %v1695_v0  ;;  %1298 = vmatprep.subr.bf16.mxu1 %v1695_v0 }
 0x103   : > { %1279 = vmatpush3.bf16.msra.mxu0 %v1444_v41  ;;  %1299 = vmatpush3.bf16.msra.mxu1 %v1445_v42 }
 0x104   : > { %1280 = vmatprep.subr.bf16.mxu0 %v1695_v0  ;;  %1300 = vmatprep.subr.bf16.mxu1 %v1695_v0 }
 0x107   : > { %1281 = vmatpush3.bf16.msra.mxu0 %v1446_v43  ;;  %1301 = vmatpush3.bf16.msra.mxu1 %v1447_v44 }
 0x19c   : > { %v430_v45 = vpop.f32.mrb[0].mxu0  ;;  %v503_v46 = vpop.f32.mrb[0].mxu1 }
 0x19d   : > { %v1212_v47 = vpop.f32.mrb[1].mxu0  ;;  %v1224_v48 = vpop.f32.mrb[1].mxu1 }
 0x19e   : > { %v433_v49 = vpop.f32.mrb[2].mxu0  ;;  %v506_v50 = vpop.f32.mrb[2].mxu1 }
 0x19f   : > { %v1213_v51 = vpop.f32.mrb[3].mxu0  ;;  %v1225_v52 = vpop.f32.mrb[3].mxu1 }
 0x1bc   : > { %v607_v53 = vpop.f32.mrb[4].mxu0  ;;  %v712_v56 = vpop.f32.mrb[4].mxu1 }
 0x1bd   : > { %v718_v54 = vmul.f32 %v607_v53, %v430_v45  ;;  %v723_v55 = vmul.f32 %v607_v53, %v503_v46  ;;  %v1244_v57 = vpop.f32.mrb[5].mxu0  ;;  %v719_v58 = vmul.f32 %v712_v56, %v503_v46  ;;  %v722_v59 = vmul.f32 %v712_v56, %v430_v45  ;;  %v1264_v60 = vpop.f32.mrb[5].mxu1 }
 0x1be   : > { %v610_v61 = vpop.f32.mrb[6].mxu0  ;;  %v715_v62 = vpop.f32.mrb[6].mxu1 }
 0x1bf   : > { %v1245_v63 = vpop.f32.mrb[7].mxu0  ;;  %v720_v0 = vsub.f32 %v718_v54, %v719_v58  ;;  %v724_v1 = vadd.f32 %v723_v55, %v722_v59  ;;  %v1265_v2 = vpop.f32.mrb[7].mxu1 }
 0x1c1   : > { %v721_v3 = vpack.c.bf16 %v720_v0, %v720_v0  ;;  %v725_v4 = vpack.c.bf16 %v724_v1, %v724_v1 }
 0x1c3   : > { %1283 = vmatmul.mubr.bf16.vlgmr.msra.gmra.mrb[8].mxu0 %v725_v4  ;;  %1303 = vmatmul.mubr.bf16.vlgmr.msra.gmra.mrb[8].mxu1 %v721_v3 }
 0x296   : > { %v841_v5 = vpop.f32.mrb[8].mxu0  ;;  %v929_v6 = vpop.f32.mrb[8].mxu1 }
 0x297   : > { %v930_v7 = vadd.f32 %v929_v6, %v841_v5  ;;  %v1284_v8 = vpop.f32.mrb[9].mxu0  ;;  %v1304_v9 = vpop.f32.mrb[9].mxu1 }
 0x298   : > { %v844_v10 = vpop.f32.mrb[10].mxu0  ;;  %v932_v11 = vpop.f32.mrb[10].mxu1 }
 0x299   : > { %v1285_v12 = vpop.f32.mrb[11].mxu0  ;;  %v1305_v13 = vpop.f32.mrb[11].mxu1  ;;  %942 = vst [vmem:[%s353_s26] sm:$0xff] %v930_v7 }
 0x29a   : > { %1605 = shalt.err (!%p1602_p5)
}
 0x29b   : > { %s1606_s29 = scalar_lea.hbm %s2056_s2, 128  ;;  %s1610_s3 = scalar_lea.hbm %s2110_s5, 256 }
 0x29c   : > { %p1607_p6 = scmp.ne.s32.totalorder %s2056_s2, %s1606_s29  ;;  %p1611_p12 = scmp.lt.u32.totalorder %s2056_s2, %s2110_s5 }
 0x29d   : > { %p1612_p11 = scmp.lt.u32.totalorder %s1610_s3, %s1606_s29  ;;  %p1614_p0 = scmp.lt.u32.totalorder %s1606_s29, %s2056_s2 }
 0x29e   : > { %p1608_p10 = pnand %p1607_p6, %p2137_p2 }
 0x29f   : > { %p1613_p9 = por %p1612_p11, %p1611_p12 }
 0x2a0   : > { %p1609_p7 = pneg %p1608_p10 }
 0x2a1   : > { %p1615_p4 = por %p1614_p0, %p1613_p9 }
 0x2a3   : > { %p1616_p8 = pnand %p1615_p4, %p1609_p7 }
 0x2a5   : > { %1619 = shalt.err (!%p1616_p8)
}
 0x2a6   : > { %1322 = dma.vmem_to_hbm [thread:$0]  (%p2137_p2), %s2058_s27, 128, %s2056_s2, %s944_s21  }
 0x2a7 PF: > { %s2138_s28 = sld [smem:[#allocation17_spill]]  ;;  %s969_s30 = sand.u32 1, %s1666_s18  }
 0x2a8   : > { %p2140_p13 = scmp.ge.s32.totalorder %s1686_s23, 2  ;;  %s970_s16 = scalar_lea.sflag [#allocation4], %s969_s30 }
 0x2ad   : > { %p2139_p1 = scmp.ne.s32.totalorder %s2138_s28, 0 }
 0x2af   : > { %p1342_p3 = pnand %p2140_p13, %p2139_p1 }
 0x2b1   : > { %1661 = dma.done.wait (!%p1342_p3), %s970_s16, 128  }
 0x2b2   : > { %1663 = vsyncadd (!%p1342_p3), %s970_s16, 4294967168  ;;  %s25_s23 = sadd.s32 1, %s1686_s23   ;;  %s2141_s18 = smov %s1670_s19 }
 0x2b3   : > { %p22_p5 = scmp.ge.s32.totalorder %s25_s23, 4   ;;  %s2142_s19 = smov %s1674_s20 }
 0x2b4   : > { %s2143_s20 = smov %s1898_s9  ;;  %s2144_s21 = smov %s1682_s22 }
 0x2b5   : > { %s2145_s22 = smov %s2147_s6  ;;  %24 = sbr.rel (!%p22_p5) target bundleno = 13 (0xd), region = 120 }
 0x2bc   :  { %975 = vsyncpa [#allocation3], 1 }
 0x2bd   :  { %977 = vsyncpa [#allocation3 + $0x1], 1 }
 0x2be   :  { %978 = vsyncpa [#allocation6], 1 }
 0x2bf   :  { %980 = vsyncpa [#allocation6 + $0x1], 1 }
 0x2c0   :  { %981 = vsyncpa [#allocation9], 1 }
 0x2c1   :  { %982 = vsyncpa [#allocation4], 1 }
 0x2c2   :  { %984 = vsyncpa [#allocation4 + $0x1], 1 }

</bundles_post_ra>
